<compile_context>
chip_gen: v7x
topology: tpu7x:2x2x1
jax: 0.10.0
libtpu: 0.0.40
codegen_flags: <defaults>
</compile_context>

<pallas_src>
import functools

import jax
import jax.numpy as jnp
from jax.experimental import pallas as pl
from jax.experimental.pallas import tpu as pltpu

_LANE = 128
_VMEM_LIMIT = 48 * 1024 * 1024  # headroom even on v7x (64 MiB physical VMEM)


def _round_up(v, m):
    return (v + m - 1) // m * m


def _pick_tile(n, cap):
    """Largest tile <= cap that divides n (n and cap are multiples of 128)."""
    t = min(cap, n)
    while n % t:
        t -= _LANE
    return t


def _pad2d(x, rows, cols):
    r, c = x.shape
    return jnp.pad(x, ((0, rows - r), (0, cols - c)))


# ----------------------------------------------------------------------------
# Fused feature transform:  xw = x @ [W_self | W_neigh]
#   -> xw_self (f32, bias folded in),  xw_neigh (bf16, ready for the MXU)
# ----------------------------------------------------------------------------
def _dense_kernel(x_ref, w_ref, b_ref, s_ref, n_ref, *, f_out):
    xw = jnp.dot(x_ref[...], w_ref[...], preferred_element_type=jnp.float32)
    # f_out is a multiple of 128 -> lane-aligned slices, no layout shuffle.
    s_ref[...] = xw[:, :f_out] + b_ref[...]
    n_ref[...] = xw[:, f_out:].astype(jnp.bfloat16)


def dense_split(x, w_self, w_neigh, bias):
    n, f_in = x.shape
    f_out = w_self.shape[1]
    w = jnp.concatenate([w_self, w_neigh], axis=1)   # (f_in, 2*f_out)
    tm = _pick_tile(n, 512)
    return pl.pallas_call(
        functools.partial(_dense_kernel, f_out=f_out),
        out_shape=(jax.ShapeDtypeStruct((n, f_out), jnp.float32),
                   jax.ShapeDtypeStruct((n, f_out), jnp.bfloat16)),
        grid=(n // tm,),
        in_specs=[pl.BlockSpec((tm, f_in), lambda i: (i, 0)),
                  pl.BlockSpec((f_in, 2 * f_out), lambda i: (0, 0)),
                  pl.BlockSpec((1, f_out), lambda i: (0, 0))],
        out_specs=(pl.BlockSpec((tm, f_out), lambda i: (i, 0)),
                   pl.BlockSpec((tm, f_out), lambda i: (i, 0))),
        compiler_params=pltpu.CompilerParams(
            dimension_semantics=("parallel",),
            vmem_limit_bytes=_VMEM_LIMIT),
    )(x, w, bias)


# ----------------------------------------------------------------------------
# Tiled aggregation:
#   out = xw_self(+b) + (A @ xw_neigh) / max(rowsum(A), 1)   [+ ReLU]
# Degrees are accumulated from the SAME A tiles the matmul streams (XLU slot,
# free next to the MXU), so no extra HBM pass over A is needed.
# ----------------------------------------------------------------------------
def _sage_aggregate_kernel(a_ref, xwn_ref, xws_ref, o_ref,
                           acc_ref, deg_ref, *, apply_relu):
    k = pl.program_id(1)

    @pl.when(k == 0)
    def _():
        acc_ref[...] = jnp.zeros_like(acc_ref)
        deg_ref[...] = jnp.zeros_like(deg_ref)

    a = a_ref[...]                                 # 0/1 in bf16 (exact)
    acc_ref[...] += jnp.dot(a, xwn_ref[...],       # bf16 x bf16 -> f32 acc
                            preferred_element_type=jnp.float32)
    deg_ref[...] += jnp.sum(a.astype(jnp.float32), axis=-1, keepdims=True)

    @pl.when(k == pl.num_programs(1) - 1)
    def _():
        # DGL mean aggregator clamps degree to >= 1 (isolated nodes -> 0 mean).
        inv = 1.0 / jnp.maximum(deg_ref[...], 1.0)   # once per row block
        h = xws_ref[...] + inv * acc_ref[...]
        if apply_relu:
            h = jnp.maximum(h, 0.0)
        o_ref[...] = h.astype(o_ref.dtype)


def sage_layer(adj, x, w_self, w_neigh, bias, *, apply_relu):
    """One SAGEConv('mean') layer.

    h = (x @ W_self + b) + diag(1/deg) @ (A @ (x @ W_neigh))
    (associativity: the N^2-wide matmul runs at width F_out, not F_in).
    All shapes are already padded to lane-dense sizes.
    """
    n = adj.shape[0]
    f_out = w_self.shape[1]
    tm = _pick_tile(n, 256)
    tk = _pick_tile(n, 512)

    xw_self, xw_neigh = dense_split(x, w_self, w_neigh, bias)

    kernel = functools.partial(_sage_aggregate_kernel, apply_relu=apply_relu)
    return pl.pallas_call(
        kernel,
        out_shape=jax.ShapeDtypeStruct((n, f_out), jnp.float32),
        grid=(n // tm, n // tk),          # (row blocks, adjacency-K blocks)
        in_specs=[
            pl.BlockSpec((tm, tk), lambda i, k: (i, k)),       # A tile (bf16)
            pl.BlockSpec((tk, f_out), lambda i, k: (k, 0)),    # xw_neigh (bf16)
            pl.BlockSpec((tm, f_out), lambda i, k: (i, 0)),    # xw_self (+bias)
        ],
        out_specs=pl.BlockSpec((tm, f_out), lambda i, k: (i, 0)),
        scratch_shapes=[pltpu.VMEM((tm, f_out), jnp.float32),  # f32 accumulator
                        pltpu.VMEM((tm, 1), jnp.float32)],     # degree accumulator
        compiler_params=pltpu.CompilerParams(
            dimension_semantics=("parallel", "arbitrary"),
            vmem_limit_bytes=_VMEM_LIMIT),
    )(adj, xw_neigh, xw_self)


# ----------------------------------------------------------------------------
# Full model forward:  h = conv2( relu( conv1(x) ) )
# ----------------------------------------------------------------------------
def model_graphsage_forward(adj, x, params):
    n, in_feats = x.shape
    h_feats = params["w_self1"].shape[1]
    out_feats = params["w_self2"].shape[1]

    n_pad = _round_up(n, _LANE)
    fi_pad = _round_up(in_feats, _LANE)
    fh_pad = _round_up(h_feats, _LANE)
    fo_pad = _round_up(out_feats, _LANE)

    # 0/1 adjacency in bf16: values exact, half the HBM bytes for the dominant
    # N^2 array.  Zero padding keeps padded rows/cols out of valid results.
    adj_p = _pad2d(adj.astype(jnp.float32), n_pad, n_pad).astype(jnp.bfloat16)
    x_p = _pad2d(x.astype(jnp.float32), n_pad, fi_pad)

    # Lane-dense (multiple-of-128) parameter padding; zero pad => exact math.
    ws1 = _pad2d(params["w_self1"], fi_pad, fh_pad)
    wn1 = _pad2d(params["w_neigh1"], fi_pad, fh_pad)
    b1 = _pad2d(params["b1"].reshape(1, -1), 1, fh_pad)
    ws2 = _pad2d(params["w_self2"], fh_pad, fo_pad)
    wn2 = _pad2d(params["w_neigh2"], fh_pad, fo_pad)
    b2 = _pad2d(params["b2"].reshape(1, -1), 1, fo_pad)

    h = sage_layer(adj_p, x_p, ws1, wn1, b1, apply_relu=True)   # conv1 + ReLU
    h = sage_layer(adj_p, h, ws2, wn2, b2, apply_relu=False)    # conv2
    return h[:n, :out_feats]


def init_params(key, in_feats, h_feats, out_feats):
    ks = jax.random.split(key, 6)

    def lin(k, fi, fo):
        bound = 1.0 / jnp.sqrt(jnp.float32(fi))
        return jax.random.uniform(k, (fi, fo), jnp.float32, -bound, bound)

    return {
        "w_self1":  lin(ks[0], in_feats, h_feats),
        "w_neigh1": lin(ks[1], in_feats, h_feats),
        "b1":       jax.random.uniform(ks[2], (h_feats,), jnp.float32, -0.1, 0.1),
        "w_self2":  lin(ks[3], h_feats, out_feats),
        "w_neigh2": lin(ks[4], h_feats, out_feats),
        "b2":       jax.random.uniform(ks[5], (out_feats,), jnp.float32, -0.1, 0.1),
    }


if __name__ == "__main__":
    key = jax.random.PRNGKey(0)
    k_adj, k_feat, k_param = jax.random.split(key, 3)

    N, IN_FEATS, H_FEATS, OUT_FEATS = 8, 16, 32, 8

    # Random directed graph as dense 0/1 adjacency.
    adj = (jax.random.uniform(k_adj, (N, N)) < 0.4).astype(jnp.float32)
    x = jax.random.normal(k_feat, (N, IN_FEATS), dtype=jnp.float32)
    params = init_params(k_param, IN_FEATS, H_FEATS, OUT_FEATS)

    out = jax.block_until_ready(jax.jit(model_graphsage_forward)(adj, x, params))
    assert out.shape == (N, OUT_FEATS)

    # Pure-JAX references of the same math.
    hi = jax.lax.Precision.HIGHEST

    def ref_layer(a, h, ws, wn, b, relu, bf16_agg):
        inv = 1.0 / jnp.maximum(a.sum(-1, keepdims=True), 1.0)
        xw_s = jnp.dot(h, ws, precision=hi)
        xw_n = jnp.dot(h, wn, precision=hi)
        if bf16_agg:  # mirrors the kernel's bf16 MXU operands
            agg = jnp.dot(a.astype(jnp.bfloat16), xw_n.astype(jnp.bfloat16),
                          preferred_element_type=jnp.float32)
        else:
            agg = jnp.dot(a, xw_n, precision=hi)
        r = xw_s + inv * agg + b
        return jnp.maximum(r, 0.0) if relu else r

    def ref_fwd(bf16_agg):
        h = ref_layer(adj, x, params["w_self1"], params["w_neigh1"],
                      params["b1"], True, bf16_agg)
        return ref_layer(adj, h, params["w_self2"], params["w_neigh2"],
                         params["b2"], False, bf16_agg)

    ref_bf16 = ref_fwd(True)   # same rounding as the kernel -> tight check
    ref_f32 = ref_fwd(False)   # full-precision math -> loose sanity check
    assert jnp.allclose(out, ref_bf16, atol=1e-2, rtol=1e-2), \
        float(jnp.max(jnp.abs(out - ref_bf16)))
    assert jnp.allclose(out, ref_f32, atol=8e-2, rtol=8e-2), \
        float(jnp.max(jnp.abs(out - ref_f32)))

    print("KERNEL_OK")
</pallas_src>

<mosaic_0001>
module attributes {stable_mosaic.version = 11 : i64} {
  func.func @_dense_kernel(%arg0: i32, %arg1: memref<128x128xf32, #tpu.memory_space<vmem>>, %arg2: memref<128x256xf32, #tpu.memory_space<vmem>>, %arg3: memref<1x128xf32, #tpu.memory_space<vmem>>, %arg4: memref<128x128xf32, #tpu.memory_space<vmem>>, %arg5: memref<128x128xbf16, #tpu.memory_space<vmem>>) attributes {dimension_semantics = [#tpu.dimension_semantics<parallel>], iteration_bounds = array<i64: 1>, scalar_prefetch = 0 : i64, scratch_operands = 0 : i64, tpu.core_type = #tpu.core_type<tc>, window_params = [{transform_indices = @transform_0, window_bounds = array<i64: 128, 128>}, {pipeline_mode = #tpu.pipeline_mode<synchronous>, transform_indices = @transform_1, window_bounds = array<i64: 128, 256>}, {pipeline_mode = #tpu.pipeline_mode<synchronous>, transform_indices = @transform_2, window_bounds = array<i64: 1, 128>}, {transform_indices = @transform_3, window_bounds = array<i64: 128, 128>}, {transform_indices = @transform_4, window_bounds = array<i64: 128, 128>}]} {
    %c0 = arith.constant 0 : index
    %c0_0 = arith.constant 0 : index
    %0 = vector.load %arg1[%c0, %c0_0] : memref<128x128xf32, #tpu.memory_space<vmem>>, vector<128x128xf32>
    %c0_1 = arith.constant 0 : index
    %c0_2 = arith.constant 0 : index
    %1 = vector.load %arg2[%c0_1, %c0_2] : memref<128x256xf32, #tpu.memory_space<vmem>>, vector<128x256xf32>
    %cst = arith.constant dense<0.000000e+00> : vector<128x256xf32>
    %2 = tpu.matmul %0, %1, %cst {dimension_numbers = #tpu.dot_dimension_numbers<[1], [0], [0], [1], [0, 0, 1, 1], [], []>} : vector<128x128xf32>, vector<128x256xf32>, vector<128x256xf32> -> vector<128x256xf32>
    %3 = vector.extract_strided_slice %2 {offsets = [0, 0], sizes = [128, 128], strides = [1, 1]} : vector<128x256xf32> to vector<128x128xf32>
    %c0_3 = arith.constant 0 : index
    %c0_4 = arith.constant 0 : index
    %4 = vector.load %arg3[%c0_3, %c0_4] : memref<1x128xf32, #tpu.memory_space<vmem>>, vector<1x128xf32>
    %5 = vector.broadcast %4 : vector<1x128xf32> to vector<128x128xf32>
    %6 = arith.addf %3, %5 : vector<128x128xf32>
    %c0_5 = arith.constant 0 : index
    %c0_6 = arith.constant 0 : index
    %7 = vector.load %arg4[%c0_5, %c0_6] : memref<128x128xf32, #tpu.memory_space<vmem>>, vector<128x128xf32>
    tpu.vector_store %arg4[%c0_5, %c0_6], %6 {strides = array<i32>} : memref<128x128xf32, #tpu.memory_space<vmem>>, vector<128x128xf32>,
    %8 = vector.extract_strided_slice %2 {offsets = [0, 128], sizes = [128, 128], strides = [1, 1]} : vector<128x256xf32> to vector<128x128xf32>
    %9 = arith.truncf %8 : vector<128x128xf32> to vector<128x128xbf16>
    %c0_7 = arith.constant 0 : index
    %c0_8 = arith.constant 0 : index
    %10 = vector.load %arg5[%c0_7, %c0_8] : memref<128x128xbf16, #tpu.memory_space<vmem>>, vector<128x128xbf16>
    tpu.vector_store %arg5[%c0_7, %c0_8], %9 {strides = array<i32>} : memref<128x128xbf16, #tpu.memory_space<vmem>>, vector<128x128xbf16>,
    return
  }
  func.func @transform_0(%arg0: i32) -> (i32, i32) {
    %c0_i32 = arith.constant 0 : i32
    %c0_i32_0 = arith.constant 0 : i32
    return %arg0, %c0_i32 : i32, i32
  }
  func.func @transform_1(%arg0: i32) -> (i32, i32) {
    %c0_i32 = arith.constant 0 : i32
    %c0_i32_0 = arith.constant 0 : i32
    %c0_i32_1 = arith.constant 0 : i32
    return %c0_i32, %c0_i32_0 : i32, i32
  }
  func.func @transform_2(%arg0: i32) -> (i32, i32) {
    %c0_i32 = arith.constant 0 : i32
    %c0_i32_0 = arith.constant 0 : i32
    %c0_i32_1 = arith.constant 0 : i32
    return %c0_i32, %c0_i32_0 : i32, i32
  }
  func.func @transform_3(%arg0: i32) -> (i32, i32) {
    %c0_i32 = arith.constant 0 : i32
    %c0_i32_0 = arith.constant 0 : i32
    return %arg0, %c0_i32 : i32, i32
  }
  func.func @transform_4(%arg0: i32) -> (i32, i32) {
    %c0_i32 = arith.constant 0 : i32
    %c0_i32_0 = arith.constant 0 : i32
    return %arg0, %c0_i32 : i32, i32
  }
}

module attributes {stable_mosaic.version = 11 : i64} {
  func.func @_sage_aggregate_kernel(%arg0: i32, %arg1: i32, %arg2: memref<128x128xbf16, #tpu.memory_space<vmem>>, %arg3: memref<128x128xbf16, #tpu.memory_space<vmem>>, %arg4: memref<128x128xf32, #tpu.memory_space<vmem>>, %arg5: memref<128x128xf32, #tpu.memory_space<vmem>>, %arg6: memref<128x128xf32, #tpu.memory_space<vmem>>, %arg7: memref<128x1xf32, #tpu.memory_space<vmem>>) attributes {dimension_semantics = [#tpu.dimension_semantics<parallel>, #tpu.dimension_semantics<arbitrary>], iteration_bounds = array<i64: 1, 1>, scalar_prefetch = 0 : i64, scratch_operands = 2 : i64, tpu.core_type = #tpu.core_type<tc>, window_params = [{transform_indices = @transform_0, window_bounds = array<i64: 128, 128>}, {transform_indices = @transform_1, window_bounds = array<i64: 128, 128>}, {transform_indices = @transform_2, window_bounds = array<i64: 128, 128>}, {transform_indices = @transform_3, window_bounds = array<i64: 128, 128>}]} {
    %c0_i32 = arith.constant 0 : i32
    %0 = arith.cmpi eq, %arg1, %c0_i32 : i32
    %1 = arith.extui %0 : i1 to i32
    %c0_i32_0 = arith.constant 0 : i32
    %2 = arith.cmpi ne, %1, %c0_i32_0 : i32
    scf.if %2 {
      %cst_15 = arith.constant 0.000000e+00 : f32
      %18 = vector.broadcast %cst_15 : f32 to vector<128x128xf32>
      %c0_16 = arith.constant 0 : index
      %c0_17 = arith.constant 0 : index
      %19 = vector.load %arg6[%c0_16, %c0_17] : memref<128x128xf32, #tpu.memory_space<vmem>>, vector<128x128xf32>
      tpu.vector_store %arg6[%c0_16, %c0_17], %18 {strides = array<i32>} : memref<128x128xf32, #tpu.memory_space<vmem>>, vector<128x128xf32>,
      %cst_18 = arith.constant 0.000000e+00 : f32
      %20 = vector.broadcast %cst_18 : f32 to vector<128x1xf32>
      %c0_19 = arith.constant 0 : index
      %c0_20 = arith.constant 0 : index
      %21 = vector.load %arg7[%c0_19, %c0_20] : memref<128x1xf32, #tpu.memory_space<vmem>>, vector<128x1xf32>
      tpu.vector_store %arg7[%c0_19, %c0_20], %20 {strides = array<i32>} : memref<128x1xf32, #tpu.memory_space<vmem>>, vector<128x1xf32>,
    } else {
    }
    %c0 = arith.constant 0 : index
    %c0_1 = arith.constant 0 : index
    %3 = vector.load %arg2[%c0, %c0_1] : memref<128x128xbf16, #tpu.memory_space<vmem>>, vector<128x128xbf16>
    %c0_2 = arith.constant 0 : index
    %c0_3 = arith.constant 0 : index
    %4 = vector.load %arg6[%c0_2, %c0_3] : memref<128x128xf32, #tpu.memory_space<vmem>>, vector<128x128xf32>
    %c0_4 = arith.constant 0 : index
    %c0_5 = arith.constant 0 : index
    %5 = vector.load %arg3[%c0_4, %c0_5] : memref<128x128xbf16, #tpu.memory_space<vmem>>, vector<128x128xbf16>
    %cst = arith.constant dense<0.000000e+00> : vector<128x128xf32>
    %6 = tpu.matmul %3, %5, %cst {dimension_numbers = #tpu.dot_dimension_numbers<[1], [0], [0], [1], [0, 0, 1, 1], [], []>} : vector<128x128xbf16>, vector<128x128xbf16>, vector<128x128xf32> -> vector<128x128xf32>
    %7 = arith.addf %4, %6 : vector<128x128xf32>
    %c0_6 = arith.constant 0 : index
    %c0_7 = arith.constant 0 : index
    %8 = vector.load %arg6[%c0_6, %c0_7] : memref<128x128xf32, #tpu.memory_space<vmem>>, vector<128x128xf32>
    tpu.vector_store %arg6[%c0_6, %c0_7], %7 {strides = array<i32>} : memref<128x128xf32, #tpu.memory_space<vmem>>, vector<128x128xf32>,
    %c0_8 = arith.constant 0 : index
    %c0_9 = arith.constant 0 : index
    %9 = vector.load %arg7[%c0_8, %c0_9] : memref<128x1xf32, #tpu.memory_space<vmem>>, vector<128x1xf32>
    %10 = arith.extf %3 : vector<128x128xbf16> to vector<128x128xf32>
    %cst_10 = arith.constant dense<0.000000e+00> : vector<128xf32>
    %11 = vector.multi_reduction <add>, %10, %cst_10 [1] : vector<128x128xf32> to vector<128xf32>
    %12 = vector.shape_cast %11 : vector<128xf32> to vector<128x1xf32>
    %13 = arith.addf %9, %12 : vector<128x1xf32>
    %c0_11 = arith.constant 0 : index
    %c0_12 = arith.constant 0 : index
    %14 = vector.load %arg7[%c0_11, %c0_12] : memref<128x1xf32, #tpu.memory_space<vmem>>, vector<128x1xf32>
    tpu.vector_store %arg7[%c0_11, %c0_12], %13 {strides = array<i32>} : memref<128x1xf32, #tpu.memory_space<vmem>>, vector<128x1xf32>,
    %c0_i32_13 = arith.constant 0 : i32
    %15 = arith.cmpi eq, %arg1, %c0_i32_13 : i32
    %16 = arith.extui %15 : i1 to i32
    %c0_i32_14 = arith.constant 0 : i32
    %17 = arith.cmpi ne, %16, %c0_i32_14 : i32
    scf.if %17 {
      %c0_15 = arith.constant 0 : index
      %c0_16 = arith.constant 0 : index
      %18 = vector.load %arg7[%c0_15, %c0_16] : memref<128x1xf32, #tpu.memory_space<vmem>>, vector<128x1xf32>
      %cst_17 = arith.constant 1.000000e+00 : f32
      %19 = vector.broadcast %cst_17 : f32 to vector<128x1xf32>
      %20 = arith.maximumf %18, %19 : vector<128x1xf32>
      %cst_18 = arith.constant 1.000000e+00 : f32
      %21 = vector.broadcast %cst_18 : f32 to vector<128x1xf32>
      %22 = arith.divf %21, %20 : vector<128x1xf32>
      %c0_19 = arith.constant 0 : index
      %c0_20 = arith.constant 0 : index
      %23 = vector.load %arg4[%c0_19, %c0_20] : memref<128x128xf32, #tpu.memory_space<vmem>>, vector<128x128xf32>
      %c0_21 = arith.constant 0 : index
      %c0_22 = arith.constant 0 : index
      %24 = vector.load %arg6[%c0_21, %c0_22] : memref<128x128xf32, #tpu.memory_space<vmem>>, vector<128x128xf32>
      %25 = vector.broadcast %22 : vector<128x1xf32> to vector<128x128xf32>
      %26 = arith.mulf %25, %24 : vector<128x128xf32>
      %27 = arith.addf %23, %26 : vector<128x128xf32>
      %cst_23 = arith.constant 0.000000e+00 : f32
      %28 = vector.broadcast %cst_23 : f32 to vector<128x128xf32>
      %29 = arith.maximumf %27, %28 : vector<128x128xf32>
      %c0_24 = arith.constant 0 : index
      %c0_25 = arith.constant 0 : index
      %30 = vector.load %arg5[%c0_24, %c0_25] : memref<128x128xf32, #tpu.memory_space<vmem>>, vector<128x128xf32>
      tpu.vector_store %arg5[%c0_24, %c0_25], %29 {strides = array<i32>} : memref<128x128xf32, #tpu.memory_space<vmem>>, vector<128x128xf32>,
    } else {
    }
    return
  }
  func.func @transform_0(%arg0: i32, %arg1: i32) -> (i32, i32) {
    %c0_i32 = arith.constant 0 : i32
    return %arg0, %arg1 : i32, i32
  }
  func.func @transform_1(%arg0: i32, %arg1: i32) -> (i32, i32) {
    %c0_i32 = arith.constant 0 : i32
    %c0_i32_0 = arith.constant 0 : i32
    return %arg1, %c0_i32 : i32, i32
  }
  func.func @transform_2(%arg0: i32, %arg1: i32) -> (i32, i32) {
    %c0_i32 = arith.constant 0 : i32
    %c0_i32_0 = arith.constant 0 : i32
    return %arg0, %c0_i32 : i32, i32
  }
  func.func @transform_3(%arg0: i32, %arg1: i32) -> (i32, i32) {
    %c0_i32 = arith.constant 0 : i32
    %c0_i32_0 = arith.constant 0 : i32
    return %arg0, %c0_i32 : i32, i32
  }
}

module attributes {stable_mosaic.version = 11 : i64} {
  func.func @_sage_aggregate_kernel(%arg0: i32, %arg1: i32, %arg2: memref<128x128xbf16, #tpu.memory_space<vmem>>, %arg3: memref<128x128xbf16, #tpu.memory_space<vmem>>, %arg4: memref<128x128xf32, #tpu.memory_space<vmem>>, %arg5: memref<128x128xf32, #tpu.memory_space<vmem>>, %arg6: memref<128x128xf32, #tpu.memory_space<vmem>>, %arg7: memref<128x1xf32, #tpu.memory_space<vmem>>) attributes {dimension_semantics = [#tpu.dimension_semantics<parallel>, #tpu.dimension_semantics<arbitrary>], iteration_bounds = array<i64: 1, 1>, scalar_prefetch = 0 : i64, scratch_operands = 2 : i64, tpu.core_type = #tpu.core_type<tc>, window_params = [{transform_indices = @transform_0, window_bounds = array<i64: 128, 128>}, {transform_indices = @transform_1, window_bounds = array<i64: 128, 128>}, {transform_indices = @transform_2, window_bounds = array<i64: 128, 128>}, {transform_indices = @transform_3, window_bounds = array<i64: 128, 128>}]} {
    %c0_i32 = arith.constant 0 : i32
    %0 = arith.cmpi eq, %arg1, %c0_i32 : i32
    %1 = arith.extui %0 : i1 to i32
    %c0_i32_0 = arith.constant 0 : i32
    %2 = arith.cmpi ne, %1, %c0_i32_0 : i32
    scf.if %2 {
      %cst_15 = arith.constant 0.000000e+00 : f32
      %18 = vector.broadcast %cst_15 : f32 to vector<128x128xf32>
      %c0_16 = arith.constant 0 : index
      %c0_17 = arith.constant 0 : index
      %19 = vector.load %arg6[%c0_16, %c0_17] : memref<128x128xf32, #tpu.memory_space<vmem>>, vector<128x128xf32>
      tpu.vector_store %arg6[%c0_16, %c0_17], %18 {strides = array<i32>} : memref<128x128xf32, #tpu.memory_space<vmem>>, vector<128x128xf32>,
      %cst_18 = arith.constant 0.000000e+00 : f32
      %20 = vector.broadcast %cst_18 : f32 to vector<128x1xf32>
      %c0_19 = arith.constant 0 : index
      %c0_20 = arith.constant 0 : index
      %21 = vector.load %arg7[%c0_19, %c0_20] : memref<128x1xf32, #tpu.memory_space<vmem>>, vector<128x1xf32>
      tpu.vector_store %arg7[%c0_19, %c0_20], %20 {strides = array<i32>} : memref<128x1xf32, #tpu.memory_space<vmem>>, vector<128x1xf32>,
    } else {
    }
    %c0 = arith.constant 0 : index
    %c0_1 = arith.constant 0 : index
    %3 = vector.load %arg2[%c0, %c0_1] : memref<128x128xbf16, #tpu.memory_space<vmem>>, vector<128x128xbf16>
    %c0_2 = arith.constant 0 : index
    %c0_3 = arith.constant 0 : index
    %4 = vector.load %arg6[%c0_2, %c0_3] : memref<128x128xf32, #tpu.memory_space<vmem>>, vector<128x128xf32>
    %c0_4 = arith.constant 0 : index
    %c0_5 = arith.constant 0 : index
    %5 = vector.load %arg3[%c0_4, %c0_5] : memref<128x128xbf16, #tpu.memory_space<vmem>>, vector<128x128xbf16>
    %cst = arith.constant dense<0.000000e+00> : vector<128x128xf32>
    %6 = tpu.matmul %3, %5, %cst {dimension_numbers = #tpu.dot_dimension_numbers<[1], [0], [0], [1], [0, 0, 1, 1], [], []>} : vector<128x128xbf16>, vector<128x128xbf16>, vector<128x128xf32> -> vector<128x128xf32>
    %7 = arith.addf %4, %6 : vector<128x128xf32>
    %c0_6 = arith.constant 0 : index
    %c0_7 = arith.constant 0 : index
    %8 = vector.load %arg6[%c0_6, %c0_7] : memref<128x128xf32, #tpu.memory_space<vmem>>, vector<128x128xf32>
    tpu.vector_store %arg6[%c0_6, %c0_7], %7 {strides = array<i32>} : memref<128x128xf32, #tpu.memory_space<vmem>>, vector<128x128xf32>,
    %c0_8 = arith.constant 0 : index
    %c0_9 = arith.constant 0 : index
    %9 = vector.load %arg7[%c0_8, %c0_9] : memref<128x1xf32, #tpu.memory_space<vmem>>, vector<128x1xf32>
    %10 = arith.extf %3 : vector<128x128xbf16> to vector<128x128xf32>
    %cst_10 = arith.constant dense<0.000000e+00> : vector<128xf32>
    %11 = vector.multi_reduction <add>, %10, %cst_10 [1] : vector<128x128xf32> to vector<128xf32>
    %12 = vector.shape_cast %11 : vector<128xf32> to vector<128x1xf32>
    %13 = arith.addf %9, %12 : vector<128x1xf32>
    %c0_11 = arith.constant 0 : index
    %c0_12 = arith.constant 0 : index
    %14 = vector.load %arg7[%c0_11, %c0_12] : memref<128x1xf32, #tpu.memory_space<vmem>>, vector<128x1xf32>
    tpu.vector_store %arg7[%c0_11, %c0_12], %13 {strides = array<i32>} : memref<128x1xf32, #tpu.memory_space<vmem>>, vector<128x1xf32>,
    %c0_i32_13 = arith.constant 0 : i32
    %15 = arith.cmpi eq, %arg1, %c0_i32_13 : i32
    %16 = arith.extui %15 : i1 to i32
    %c0_i32_14 = arith.constant 0 : i32
    %17 = arith.cmpi ne, %16, %c0_i32_14 : i32
    scf.if %17 {
      %c0_15 = arith.constant 0 : index
      %c0_16 = arith.constant 0 : index
      %18 = vector.load %arg7[%c0_15, %c0_16] : memref<128x1xf32, #tpu.memory_space<vmem>>, vector<128x1xf32>
      %cst_17 = arith.constant 1.000000e+00 : f32
      %19 = vector.broadcast %cst_17 : f32 to vector<128x1xf32>
      %20 = arith.maximumf %18, %19 : vector<128x1xf32>
      %cst_18 = arith.constant 1.000000e+00 : f32
      %21 = vector.broadcast %cst_18 : f32 to vector<128x1xf32>
      %22 = arith.divf %21, %20 : vector<128x1xf32>
      %c0_19 = arith.constant 0 : index
      %c0_20 = arith.constant 0 : index
      %23 = vector.load %arg4[%c0_19, %c0_20] : memref<128x128xf32, #tpu.memory_space<vmem>>, vector<128x128xf32>
      %c0_21 = arith.constant 0 : index
      %c0_22 = arith.constant 0 : index
      %24 = vector.load %arg6[%c0_21, %c0_22] : memref<128x128xf32, #tpu.memory_space<vmem>>, vector<128x128xf32>
      %25 = vector.broadcast %22 : vector<128x1xf32> to vector<128x128xf32>
      %26 = arith.mulf %25, %24 : vector<128x128xf32>
      %27 = arith.addf %23, %26 : vector<128x128xf32>
      %c0_23 = arith.constant 0 : index
      %c0_24 = arith.constant 0 : index
      %28 = vector.load %arg5[%c0_23, %c0_24] : memref<128x128xf32, #tpu.memory_space<vmem>>, vector<128x128xf32>
      tpu.vector_store %arg5[%c0_23, %c0_24], %27 {strides = array<i32>} : memref<128x128xf32, #tpu.memory_space<vmem>>, vector<128x128xf32>,
    } else {
    }
    return
  }
  func.func @transform_0(%arg0: i32, %arg1: i32) -> (i32, i32) {
    %c0_i32 = arith.constant 0 : i32
    return %arg0, %arg1 : i32, i32
  }
  func.func @transform_1(%arg0: i32, %arg1: i32) -> (i32, i32) {
    %c0_i32 = arith.constant 0 : i32
    %c0_i32_0 = arith.constant 0 : i32
    return %arg1, %c0_i32 : i32, i32
  }
  func.func @transform_2(%arg0: i32, %arg1: i32) -> (i32, i32) {
    %c0_i32 = arith.constant 0 : i32
    %c0_i32_0 = arith.constant 0 : i32
    return %arg0, %c0_i32 : i32, i32
  }
  func.func @transform_3(%arg0: i32, %arg1: i32) -> (i32, i32) {
    %c0_i32 = arith.constant 0 : i32
    %c0_i32_0 = arith.constant 0 : i32
    return %arg0, %c0_i32 : i32, i32
  }
}

</mosaic_0001>

<bundles_post_ra>
// kernel: model_graphsage_forward.4
= control target key start
LH: loop header
LB: loop body
LE: loop exit
PB: predicated region body
PF: predicated region fallthrough
CT: control target
= control target key end

     0   :  { %v481_v3 = vmov 0.0   ;;  %s760_s1 = inlined_call_operand.vmem [shape: f32[128,256], index: 1, kind: input, shape index: {}]   ;;  %s761_s0 = inlined_call_operand.vmem [shape: f32[128,128], index: 0, kind: input, shape index: {}]   ;;  %s762_s2 = inlined_call_operand.vmem [shape: f32[1,128], index: 2, kind: input, shape index: {}]   ;;  %s763_s3 = inlined_call_operand.vmem [shape: f32[128,128], index: 3, kind: output, shape index: {0}]   ;;  %s764_s4 = inlined_call_operand.vmem [shape: bf16[128,128], index: 4, kind: output, shape index: {1}]  }
   0x1   :  { %v33_v0 = vld [vmem:[%s760_s1 + $0x8] sm:$0xff]  ;;  %v35_v1 = vld [vmem:[%s760_s1 + $0x18] sm:$0xff]  ;;  %v32_v2 = vld [vmem:[%s760_s1] sm:$0xff]  ;;  %128 = vmatprep.mubr.f32.mxu0 %v481_v3  ;;  %176 = vmatprep.mubr.f32.mxu1 %v481_v3 }
   0x2   :  { %v432_v4 = vpack.c.bf16 %v35_v1, %v33_v0  ;;  %v34_v5 = vld [vmem:[%s760_s1 + $0x10] sm:$0xff]  ;;  %v37_v6 = vld [vmem:[%s760_s1 + $0x28] sm:$0xff]  ;;  %v39_v7 = vld [vmem:[%s760_s1 + $0x38] sm:$0xff] }
   0x3   :  { %v434_v8 = vpack.c.bf16 %v34_v5, %v32_v2  ;;  %v436_v9 = vpack.c.bf16 %v39_v7, %v37_v6  ;;  %v36_v10 = vld [vmem:[%s760_s1 + $0x20] sm:$0xff]  ;;  %v38_v11 = vld [vmem:[%s760_s1 + $0x30] sm:$0xff]  ;;  %v41_v12 = vld [vmem:[%s760_s1 + $0x48] sm:$0xff] }
   0x4   :  { %433 = vmatprep.subr.bf16.mxu0 %v432_v4  ;;  %464 = vmatprep.subr.bf16.mxu1 %v432_v4  ;;  %v43_v13 = vld [vmem:[%s760_s1 + $0x58] sm:$0xff]  ;;  %v438_v14 = vpack.c.bf16 %v38_v11, %v36_v10  ;;  %v40_v16 = vld [vmem:[%s760_s1 + $0x40] sm:$0xff]  ;;  %v42_v17 = vld [vmem:[%s760_s1 + $0x50] sm:$0xff] }
   0x5   :  { %435 = vmatpush1.bf16.msra.mxu0 %v434_v8  ;;  %472 = vmatpush1.bf16.msra.mxu1 %v434_v8  ;;  %v440_v15 = vpack.c.bf16 %v43_v13, %v41_v12  ;;  %v45_v18 = vld [vmem:[%s760_s1 + $0x68] sm:$0xff]  ;;  %v47_v19 = vld [vmem:[%s760_s1 + $0x78] sm:$0xff]  ;;  %v442_v20 = vpack.c.bf16 %v42_v17, %v40_v16  ;;  %v44_v22 = vld [vmem:[%s760_s1 + $0x60] sm:$0xff] }
   0x6   :  { %437 = vmatprep.subr.bf16.mxu0 %v436_v9  ;;  %465 = vmatprep.subr.bf16.mxu1 %v436_v9  ;;  %v444_v21 = vpack.c.bf16 %v47_v19, %v45_v18  ;;  %v46_v23 = vld [vmem:[%s760_s1 + $0x70] sm:$0xff]  ;;  %v49_v24 = vld [vmem:[%s760_s1 + $0x88] sm:$0xff]  ;;  %v51_v25 = vld [vmem:[%s760_s1 + $0x98] sm:$0xff] }
   0x7   :  { %v446_v26 = vpack.c.bf16 %v46_v23, %v44_v22  ;;  %v448_v27 = vpack.c.bf16 %v51_v25, %v49_v24  ;;  %v48_v28 = vld [vmem:[%s760_s1 + $0x80] sm:$0xff]  ;;  %v50_v29 = vld [vmem:[%s760_s1 + $0x90] sm:$0xff]  ;;  %v53_v30 = vld [vmem:[%s760_s1 + $0xa8] sm:$0xff] }
   0x8   :  { %v55_v31 = vld [vmem:[%s760_s1 + $0xb8] sm:$0xff]  ;;  %v450_v32 = vpack.c.bf16 %v50_v29, %v48_v28  ;;  %v52_v34 = vld [vmem:[%s760_s1 + $0xa0] sm:$0xff]  ;;  %v54_v35 = vld [vmem:[%s760_s1 + $0xb0] sm:$0xff] }
   0x9   :  { %439 = vmatpush1.bf16.msra.mxu0 %v438_v14  ;;  %473 = vmatpush1.bf16.msra.mxu1 %v438_v14  ;;  %v452_v33 = vpack.c.bf16 %v55_v31, %v53_v30  ;;  %v57_v36 = vld [vmem:[%s760_s1 + $0xc8] sm:$0xff]  ;;  %v59_v37 = vld [vmem:[%s760_s1 + $0xd8] sm:$0xff]  ;;  %v454_v38 = vpack.c.bf16 %v54_v35, %v52_v34  ;;  %v56_v40 = vld [vmem:[%s760_s1 + $0xc0] sm:$0xff] }
   0xa   :  { %441 = vmatprep.subr.bf16.mxu0 %v440_v15  ;;  %466 = vmatprep.subr.bf16.mxu1 %v440_v15  ;;  %v456_v39 = vpack.c.bf16 %v59_v37, %v57_v36  ;;  %v58_v41 = vld [vmem:[%s760_s1 + $0xd0] sm:$0xff]  ;;  %v61_v42 = vld [vmem:[%s760_s1 + $0xe8] sm:$0xff]  ;;  %v63_v43 = vld [vmem:[%s760_s1 + $0xf8] sm:$0xff] }
   0xb   :  { %v458_v44 = vpack.c.bf16 %v58_v41, %v56_v40  ;;  %v460_v45 = vpack.c.bf16 %v63_v43, %v61_v42  ;;  %v60_v46 = vld [vmem:[%s760_s1 + $0xe0] sm:$0xff]  ;;  %v62_v47 = vld [vmem:[%s760_s1 + $0xf0] sm:$0xff]  ;;  %v17_v51 = vld [vmem:[%s761_s0 + $0x8] sm:$0xff] }
   0xc   :  { %v462_v48 = vpack.c.bf16 %v62_v47, %v60_v46  ;;  %v16_v49 = vld [vmem:[%s761_s0] sm:$0xff]  ;;  %v25_v52 = vld [vmem:[%s761_s0 + $0x48] sm:$0xff]  ;;  %v18_v53 = vld [vmem:[%s761_s0 + $0x10] sm:$0xff] }
   0xd   :  { %443 = vmatpush1.bf16.msra.mxu0 %v442_v20  ;;  %474 = vmatpush1.bf16.msra.mxu1 %v442_v20  ;;  %v24_v50 = vld [vmem:[%s761_s0 + $0x40] sm:$0xff]  ;;  %v26_v54 = vld [vmem:[%s761_s0 + $0x50] sm:$0xff]  ;;  %v19_v55 = vld [vmem:[%s761_s0 + $0x18] sm:$0xff] }
   0xe   :  { %445 = vmatprep.subr.bf16.mxu0 %v444_v21  ;;  %467 = vmatprep.subr.bf16.mxu1 %v444_v21  ;;  %v27_v56 = vld [vmem:[%s761_s0 + $0x58] sm:$0xff]  ;;  %v20_v57 = vld [vmem:[%s761_s0 + $0x20] sm:$0xff]  ;;  %v21_v59 = vld [vmem:[%s761_s0 + $0x28] sm:$0xff] }
   0xf   :  { %v28_v58 = vld [vmem:[%s761_s0 + $0x60] sm:$0xff]  ;;  %v29_v60 = vld [vmem:[%s761_s0 + $0x68] sm:$0xff]  ;;  %v22_v61 = vld [vmem:[%s761_s0 + $0x30] sm:$0xff] }
  0x10   :  { %v30_v62 = vld [vmem:[%s761_s0 + $0x70] sm:$0xff]  ;;  %v23_v63 = vld [vmem:[%s761_s0 + $0x38] sm:$0xff]  ;;  %v670_v1 = vld [vmem:[%s762_s2] ss:$0 sm:$0xff] }
  0x11   :  { %447 = vmatpush1.bf16.msra.mxu0 %v446_v26  ;;  %475 = vmatpush1.bf16.msra.mxu1 %v446_v26  ;;  %v31_v0 = vld [vmem:[%s761_s0 + $0x78] sm:$0xff] }
  0x12   :  { %449 = vmatprep.subr.bf16.mxu0 %v448_v27  ;;  %468 = vmatprep.subr.bf16.mxu1 %v448_v27 }
  0x15   :  { %451 = vmatpush1.bf16.msra.mxu0 %v450_v32  ;;  %476 = vmatpush1.bf16.msra.mxu1 %v450_v32 }
  0x16   :  { %453 = vmatprep.subr.bf16.mxu0 %v452_v33  ;;  %469 = vmatprep.subr.bf16.mxu1 %v452_v33 }
  0x19   :  { %455 = vmatpush1.bf16.msra.mxu0 %v454_v38  ;;  %477 = vmatpush1.bf16.msra.mxu1 %v454_v38 }
  0x1a   :  { %457 = vmatprep.subr.bf16.mxu0 %v456_v39  ;;  %470 = vmatprep.subr.bf16.mxu1 %v456_v39 }
  0x1d   :  { %459 = vmatpush1.bf16.msra.mxu0 %v458_v44  ;;  %478 = vmatpush1.bf16.msra.mxu1 %v458_v44 }
  0x1e   :  { %461 = vmatprep.subr.bf16.mxu0 %v460_v45  ;;  %471 = vmatprep.subr.bf16.mxu1 %v460_v45 }
  0x21   :  { %463 = vmatpush1.bf16.msra.mxu0 %v462_v48  ;;  %479 = vmatpush1.bf16.msra.mxu1 %v462_v48 }
  0x24   :  { %129 = vmatmul.mubr.f32.vlgmr.msra.gmra.mrb[0].mxu0 %v16_v49  ;;  %177 = vmatmul.mubr.f32.vlgmr.msra.gmra.mrb[0].mxu1 %v24_v50 }
  0x25   :  { %134 = vmatprep.mubr.f32.mxu0 %v481_v3  ;;  %182 = vmatprep.mubr.f32.mxu1 %v481_v3 }
  0x28   :  { %135 = vmatmul.mubr.f32.gmra.mrb[2].mxu0 %v17_v51  ;;  %183 = vmatmul.mubr.f32.gmra.mrb[2].mxu1 %v25_v52 }
  0x29   :  { %140 = vmatprep.mubr.f32.mxu0 %v481_v3  ;;  %188 = vmatprep.mubr.f32.mxu1 %v481_v3 }
  0x2c   :  { %141 = vmatmul.mubr.f32.gmra.mrb[4].mxu0 %v18_v53  ;;  %189 = vmatmul.mubr.f32.gmra.mrb[4].mxu1 %v26_v54 }
  0x2d   :  { %146 = vmatprep.mubr.f32.mxu0 %v481_v3  ;;  %194 = vmatprep.mubr.f32.mxu1 %v481_v3 }
  0x30   :  { %147 = vmatmul.mubr.f32.gmra.mrb[6].mxu0 %v19_v55  ;;  %195 = vmatmul.mubr.f32.gmra.mrb[6].mxu1 %v27_v56 }
  0x31   :  { %152 = vmatprep.mubr.f32.mxu0 %v481_v3  ;;  %200 = vmatprep.mubr.f32.mxu1 %v481_v3 }
  0x34   :  { %153 = vmatmul.mubr.f32.gmra.mrb[8].mxu0 %v20_v57  ;;  %201 = vmatmul.mubr.f32.gmra.mrb[8].mxu1 %v28_v58 }
  0x35   :  { %158 = vmatprep.mubr.f32.mxu0 %v481_v3  ;;  %206 = vmatprep.mubr.f32.mxu1 %v481_v3 }
  0x38   :  { %159 = vmatmul.mubr.f32.gmra.mrb[10].mxu0 %v21_v59  ;;  %207 = vmatmul.mubr.f32.gmra.mrb[10].mxu1 %v29_v60 }
  0x39   :  { %164 = vmatprep.mubr.f32.mxu0 %v481_v3  ;;  %212 = vmatprep.mubr.f32.mxu1 %v481_v3 }
  0x3c   :  { %165 = vmatmul.mubr.f32.gmra.mrb[12].mxu0 %v22_v61  ;;  %213 = vmatmul.mubr.f32.gmra.mrb[12].mxu1 %v30_v62 }
  0x3d   :  { %170 = vmatprep.mubr.f32.mxu0 %v481_v3  ;;  %218 = vmatprep.mubr.f32.mxu1 %v481_v3 }
  0x40   :  { %171 = vmatmul.mubr.f32.gmra.mrb[14].mxu0 %v23_v63  ;;  %219 = vmatmul.mubr.f32.gmra.mrb[14].mxu1 %v31_v0 }
  0xf7   :  { %v130_v2 = vpop.f32.mrb[0].mxu0  ;;  %v178_v4 = vpop.f32.mrb[0].mxu1 }
  0xf8   :  { %v232_v5 = vadd.f32 %v670_v1, %v130_v2  ;;  %v240_v3 = vadd.f32 %v670_v1, %v178_v4  ;;  %v132_v6 = vpop.f32.mrb[1].mxu0  ;;  %v180_v7 = vpop.f32.mrb[1].mxu1 }
  0xfa   :  { %248 = vst [vmem:[%s763_s3] sm:$0xff] %v232_v5  ;;  %256 = vst [vmem:[%s763_s3 + $0x40] sm:$0xff] %v240_v3 }
  0xfb   :  { %v136_v8 = vpop.f32.mrb[2].mxu0  ;;  %v184_v9 = vpop.f32.mrb[2].mxu1 }
  0xfc   :  { %v233_v10 = vadd.f32 %v670_v1, %v136_v8  ;;  %v241_v11 = vadd.f32 %v670_v1, %v184_v9  ;;  %v138_v12 = vpop.f32.mrb[3].mxu0  ;;  %v186_v13 = vpop.f32.mrb[3].mxu1 }
  0xfd   :  { %v388_v14 = vpack.c.bf16 %v138_v12, %v132_v6  ;;  %v408_v15 = vpack.c.bf16 %v186_v13, %v180_v7 }
  0xfe   :  { %249 = vst [vmem:[%s763_s3 + $0x8] sm:$0xff] %v233_v10  ;;  %257 = vst [vmem:[%s763_s3 + $0x48] sm:$0xff] %v241_v11 }
  0xff   :  { %389 = vst [vmem:[%s764_s4] sm:$0xff] %v388_v14   ;;  %428 = vst [vmem:[%s764_s4 + $0x20] sm:$0xff] %v408_v15   ;;  %v142_v16 = vpop.f32.mrb[4].mxu0  ;;  %v190_v17 = vpop.f32.mrb[4].mxu1 }
 0x100   :  { %v234_v18 = vadd.f32 %v670_v1, %v142_v16  ;;  %v242_v19 = vadd.f32 %v670_v1, %v190_v17  ;;  %v144_v20 = vpop.f32.mrb[5].mxu0  ;;  %v192_v21 = vpop.f32.mrb[5].mxu1 }
 0x102   :  { %250 = vst [vmem:[%s763_s3 + $0x10] sm:$0xff] %v234_v18  ;;  %258 = vst [vmem:[%s763_s3 + $0x50] sm:$0xff] %v242_v19 }
 0x103   :  { %v148_v22 = vpop.f32.mrb[6].mxu0  ;;  %v196_v23 = vpop.f32.mrb[6].mxu1 }
 0x104   :  { %v235_v24 = vadd.f32 %v670_v1, %v148_v22  ;;  %v243_v25 = vadd.f32 %v670_v1, %v196_v23  ;;  %v150_v26 = vpop.f32.mrb[7].mxu0  ;;  %v198_v27 = vpop.f32.mrb[7].mxu1 }
 0x105   :  { %v393_v28 = vpack.c.bf16 %v150_v26, %v144_v20  ;;  %v413_v29 = vpack.c.bf16 %v198_v27, %v192_v21 }
 0x106   :  { %251 = vst [vmem:[%s763_s3 + $0x18] sm:$0xff] %v235_v24  ;;  %259 = vst [vmem:[%s763_s3 + $0x58] sm:$0xff] %v243_v25 }
 0x107   :  { %425 = vst [vmem:[%s764_s4 + $0x8] sm:$0xff] %v393_v28   ;;  %429 = vst [vmem:[%s764_s4 + $0x28] sm:$0xff] %v413_v29   ;;  %v154_v30 = vpop.f32.mrb[8].mxu0  ;;  %v202_v31 = vpop.f32.mrb[8].mxu1 }
 0x108   :  { %v236_v32 = vadd.f32 %v670_v1, %v154_v30  ;;  %v244_v33 = vadd.f32 %v670_v1, %v202_v31  ;;  %v156_v34 = vpop.f32.mrb[9].mxu0  ;;  %v204_v35 = vpop.f32.mrb[9].mxu1 }
 0x10a   :  { %252 = vst [vmem:[%s763_s3 + $0x20] sm:$0xff] %v236_v32  ;;  %260 = vst [vmem:[%s763_s3 + $0x60] sm:$0xff] %v244_v33 }
 0x10b   :  { %v160_v36 = vpop.f32.mrb[10].mxu0  ;;  %v208_v37 = vpop.f32.mrb[10].mxu1 }
 0x10c   :  { %v237_v38 = vadd.f32 %v670_v1, %v160_v36  ;;  %v245_v39 = vadd.f32 %v670_v1, %v208_v37  ;;  %v162_v40 = vpop.f32.mrb[11].mxu0  ;;  %v210_v41 = vpop.f32.mrb[11].mxu1 }
 0x10d   :  { %v398_v42 = vpack.c.bf16 %v162_v40, %v156_v34  ;;  %v418_v43 = vpack.c.bf16 %v210_v41, %v204_v35 }
 0x10e   :  { %253 = vst [vmem:[%s763_s3 + $0x28] sm:$0xff] %v237_v38  ;;  %261 = vst [vmem:[%s763_s3 + $0x68] sm:$0xff] %v245_v39 }
 0x10f   :  { %426 = vst [vmem:[%s764_s4 + $0x10] sm:$0xff] %v398_v42   ;;  %430 = vst [vmem:[%s764_s4 + $0x30] sm:$0xff] %v418_v43   ;;  %v166_v44 = vpop.f32.mrb[12].mxu0  ;;  %v214_v45 = vpop.f32.mrb[12].mxu1 }
 0x110   :  { %v238_v46 = vadd.f32 %v670_v1, %v166_v44  ;;  %v246_v47 = vadd.f32 %v670_v1, %v214_v45  ;;  %v168_v48 = vpop.f32.mrb[13].mxu0  ;;  %v216_v49 = vpop.f32.mrb[13].mxu1 }
 0x112   :  { %254 = vst [vmem:[%s763_s3 + $0x30] sm:$0xff] %v238_v46  ;;  %262 = vst [vmem:[%s763_s3 + $0x70] sm:$0xff] %v246_v47 }
 0x113   :  { %v172_v50 = vpop.f32.mrb[14].mxu0  ;;  %v220_v51 = vpop.f32.mrb[14].mxu1 }
 0x114   :  { %v239_v52 = vadd.f32 %v670_v1, %v172_v50  ;;  %v247_v53 = vadd.f32 %v670_v1, %v220_v51  ;;  %v174_v54 = vpop.f32.mrb[15].mxu0  ;;  %v222_v55 = vpop.f32.mrb[15].mxu1 }
 0x115   :  { %v403_v56 = vpack.c.bf16 %v174_v54, %v168_v48  ;;  %v423_v57 = vpack.c.bf16 %v222_v55, %v216_v49 }
 0x116   :  { %255 = vst [vmem:[%s763_s3 + $0x38] sm:$0xff] %v239_v52  ;;  %263 = vst [vmem:[%s763_s3 + $0x78] sm:$0xff] %v247_v53 }
 0x117   :  { %427 = vst [vmem:[%s764_s4 + $0x18] sm:$0xff] %v403_v56   ;;  %431 = vst [vmem:[%s764_s4 + $0x38] sm:$0xff] %v423_v57  }

// kernel: model_graphsage_forward.7
= control target key start
LH: loop header
LB: loop body
LE: loop exit
PB: predicated region body
PF: predicated region fallthrough
CT: control target
= control target key end

     0   :  { %vm35_vm0 = vcmask 7168   ;;  %v793_v2 = vmov 0.0   ;;  %v794_v33 = vmov 0   ;;  %s1018_s0 = inlined_call_operand.vmem [shape: bf16[128,128], index: 0, kind: input, shape index: {}]   ;;  %s1019_s1 = inlined_call_operand.vmem [shape: bf16[128,128], index: 1, kind: input, shape index: {}]   ;;  %s1020_s2 = inlined_call_operand.vmem [shape: f32[128,128], index: 2, kind: input, shape index: {}]   ;;  %s1021_s3 = inlined_call_operand.vmem [shape: f32[128,128], index: 3, kind: output, shape index: {}]  }
   0x1   :  { %v818_v0 = vld [vmem:[%s1018_s0 + $0x8] sm:$0xff]   ;;  %v52_v1 = vld [vmem:[%s1018_s0] sm:$0xff]   ;;  %38 = vst.msk [vmem:[#allocation3 + $0x10] sm:$0xff] %vm35_vm0, %v793_v2  ;;  %36 = vst.msk [vmem:[#allocation3] sm:$0xff] %vm35_vm0, %v793_v2  ;;  %735 = vset.pattern.permute.xlu0 %v794_v33  ;;  %736 = vset.pattern.permute.xlu1 %v794_v33 }
   0x2   :  { %37 = vst.msk [vmem:[#allocation3 + $0x8] sm:$0xff] %vm35_vm0, %v793_v2  ;;  %39 = vst.msk [vmem:[#allocation3 + $0x18] sm:$0xff] %vm35_vm0, %v793_v2  ;;  %v343_v3 = vunpack.c.l.bf16 %v818_v0  ;;  %v341_v4 = vunpack.c.l.bf16 %v52_v1  ;;  %v843_v5 = vld [vmem:[%s1018_s0 + $0x10] sm:$0xff]   ;;  %v344_v6 = vunpack.c.h.bf16 %v818_v0  ;;  %v342_v7 = vunpack.c.h.bf16 %v52_v1  ;;  %v743_v8 = vld [vmem:[%s1019_s1] sm:$0xff]   ;;  %701 = vmatprep.mubr.bf16.mxu0 %v52_v1 }
   0x3   :  { %40 = vst.msk [vmem:[#allocation3 + $0x20] sm:$0xff] %vm35_vm0, %v793_v2  ;;  %41 = vst.msk [vmem:[#allocation3 + $0x28] sm:$0xff] %vm35_vm0, %v793_v2  ;;  %v744_v9 = vld [vmem:[%s1019_s1 + $0x8] sm:$0xff]   ;;  %v61_v10 = vld [vmem:[%s1018_s0 + $0x20] sm:$0xff]   ;;  %685 = vmatprep.subr.bf16.mxu0 %v743_v8  ;;  %717 = vmatprep.subr.bf16.mxu1 %v743_v8  ;;  %v346_v11 = vunpack.c.h.bf16 %v843_v5  ;;  %v345_v13 = vunpack.c.l.bf16 %v843_v5 }
   0x4   :  { %42 = vst.msk [vmem:[#allocation3 + $0x30] sm:$0xff] %vm35_vm0, %v793_v2  ;;  %43 = vst.msk [vmem:[#allocation3 + $0x38] sm:$0xff] %vm35_vm0, %v793_v2  ;;  %361 = vadd.xlane.f32.xlu1 %v343_v3  ;;  %357 = vadd.xlane.f32.xlu0 %v341_v4  ;;  %v859_v12 = vld [vmem:[%s1018_s0 + $0x18] sm:$0xff]   ;;  %v745_v14 = vld [vmem:[%s1019_s1 + $0x10] sm:$0xff]   ;;  %v350_v18 = vunpack.c.h.bf16 %v61_v10  ;;  %v349_v19 = vunpack.c.l.bf16 %v61_v10 }
   0x5   :  { %44 = vst.msk [vmem:[#allocation3 + $0x40] sm:$0xff] %vm35_vm0, %v793_v2  ;;  %45 = vst.msk [vmem:[#allocation3 + $0x48] sm:$0xff] %vm35_vm0, %v793_v2  ;;  %686 = vmatpush3.bf16.msra.mxu0 %v743_v8  ;;  %725 = vmatpush3.bf16.msra.mxu1 %v743_v8  ;;  %v348_v15 = vunpack.c.h.bf16 %v859_v12  ;;  %v347_v16 = vunpack.c.l.bf16 %v859_v12  ;;  %v746_v17 = vld [vmem:[%s1019_s1 + $0x18] sm:$0xff]   ;;  %v63_v20 = vld [vmem:[%s1018_s0 + $0x28] sm:$0xff]  }
   0x6   :  { %46 = vst.msk [vmem:[#allocation3 + $0x50] sm:$0xff] %vm35_vm0, %v793_v2  ;;  %47 = vst.msk [vmem:[#allocation3 + $0x58] sm:$0xff] %vm35_vm0, %v793_v2  ;;  %687 = vmatprep.subr.bf16.mxu0 %v744_v9  ;;  %718 = vmatprep.subr.bf16.mxu1 %v744_v9  ;;  %v747_v21 = vld [vmem:[%s1019_s1 + $0x20] sm:$0xff]   ;;  %v352_v22 = vunpack.c.h.bf16 %v63_v20  ;;  %v351_v23 = vunpack.c.l.bf16 %v63_v20  ;;  %v65_v24 = vld [vmem:[%s1018_s0 + $0x30] sm:$0xff]  }
   0x7   :  { %48 = vst.msk [vmem:[#allocation3 + $0x60] sm:$0xff] %vm35_vm0, %v793_v2  ;;  %49 = vst.msk [vmem:[#allocation3 + $0x68] sm:$0xff] %vm35_vm0, %v793_v2  ;;  %709 = vmatprep.mubr.bf16.mxu1 %v61_v10  ;;  %v748_v25 = vld [vmem:[%s1019_s1 + $0x28] sm:$0xff]   ;;  %v354_v26 = vunpack.c.h.bf16 %v65_v24  ;;  %v353_v27 = vunpack.c.l.bf16 %v65_v24  ;;  %v67_v28 = vld [vmem:[%s1018_s0 + $0x38] sm:$0xff]  }
   0x8   :  { %50 = vst.msk [vmem:[#allocation3 + $0x70] sm:$0xff] %vm35_vm0, %v793_v2  ;;  %51 = vst.msk [vmem:[#allocation3 + $0x78] sm:$0xff] %vm35_vm0, %v793_v2  ;;  %363 = vadd.xlane.f32.xlu1 %v344_v6  ;;  %359 = vadd.xlane.f32.xlu0 %v342_v7  ;;  %v749_v29 = vld [vmem:[%s1019_s1 + $0x30] sm:$0xff]   ;;  %v356_v30 = vunpack.c.h.bf16 %v67_v28  ;;  %v355_v31 = vunpack.c.l.bf16 %v67_v28  ;;  %v750_v32 = vld [vmem:[%s1019_s1 + $0x38] sm:$0xff]  }
   0x9   :  { %688 = vmatpush3.bf16.msra.mxu0 %v744_v9  ;;  %726 = vmatpush3.bf16.msra.mxu1 %v744_v9  ;;  %v327_v34 = vld [vmem:[#allocation3 + $0x10] sm:$0xff]  ;;  %v325_v35 = vld [vmem:[#allocation3] sm:$0xff]  ;;  %v328_v40 = vld [vmem:[#allocation3 + $0x18] sm:$0xff] }
   0xa   :  { %689 = vmatprep.subr.bf16.mxu0 %v745_v14  ;;  %719 = vmatprep.subr.bf16.mxu1 %v745_v14  ;;  %v326_v41 = vld [vmem:[#allocation3 + $0x8] sm:$0xff]  ;;  %v329_v47 = vld [vmem:[#allocation3 + $0x20] sm:$0xff] }
   0xb   :  { %v330_v46 = vld [vmem:[#allocation3 + $0x28] sm:$0xff]  ;;  %v332_v52 = vld [vmem:[#allocation3 + $0x38] sm:$0xff]  ;;  %v331_v54 = vld [vmem:[#allocation3 + $0x30] sm:$0xff] }
   0xc   :  { %367 = vadd.xlane.f32.xlu1 %v346_v11  ;;  %365 = vadd.xlane.f32.xlu0 %v345_v13  ;;  %v334_v61 = vld [vmem:[#allocation3 + $0x48] sm:$0xff]  ;;  %v333_v63 = vld [vmem:[#allocation3 + $0x40] sm:$0xff] }
   0xd   :  { %690 = vmatpush3.bf16.msra.mxu0 %v745_v14  ;;  %727 = vmatpush3.bf16.msra.mxu1 %v745_v14  ;;  %v336_v7 = vld [vmem:[#allocation3 + $0x58] sm:$0xff]  ;;  %v335_v8 = vld [vmem:[#allocation3 + $0x50] sm:$0xff] }
   0xe   :  { %691 = vmatprep.subr.bf16.mxu0 %v746_v17  ;;  %720 = vmatprep.subr.bf16.mxu1 %v746_v17 }
  0x10   :  { %371 = vadd.xlane.f32.xlu1 %v348_v15  ;;  %369 = vadd.xlane.f32.xlu0 %v347_v16  ;;  %v338_v15 = vld [vmem:[#allocation3 + $0x68] sm:$0xff]  ;;  %v337_v16 = vld [vmem:[#allocation3 + $0x60] sm:$0xff] }
  0x11   :  { %692 = vmatpush3.bf16.msra.mxu0 %v746_v17  ;;  %728 = vmatpush3.bf16.msra.mxu1 %v746_v17 }
  0x12   :  { %693 = vmatprep.subr.bf16.mxu0 %v747_v21  ;;  %721 = vmatprep.subr.bf16.mxu1 %v747_v21 }
  0x14   :  { %375 = vadd.xlane.f32.xlu1 %v350_v18  ;;  %373 = vadd.xlane.f32.xlu0 %v349_v19 }
  0x15   :  { %694 = vmatpush3.bf16.msra.mxu0 %v747_v21  ;;  %729 = vmatpush3.bf16.msra.mxu1 %v747_v21 }
  0x16   :  { %695 = vmatprep.subr.bf16.mxu0 %v748_v25  ;;  %722 = vmatprep.subr.bf16.mxu1 %v748_v25 }
  0x18   :  { %379 = vadd.xlane.f32.xlu1 %v352_v22  ;;  %377 = vadd.xlane.f32.xlu0 %v351_v23 }
  0x19   :  { %696 = vmatpush3.bf16.msra.mxu0 %v748_v25  ;;  %730 = vmatpush3.bf16.msra.mxu1 %v748_v25 }
  0x1a   :  { %697 = vmatprep.subr.bf16.mxu0 %v749_v29  ;;  %723 = vmatprep.subr.bf16.mxu1 %v749_v29 }
  0x1c   :  { %383 = vadd.xlane.f32.xlu1 %v354_v26  ;;  %381 = vadd.xlane.f32.xlu0 %v353_v27  ;;  %v339_v26 = vld [vmem:[#allocation3 + $0x70] sm:$0xff] }
  0x1d   :  { %698 = vmatpush3.bf16.msra.mxu0 %v749_v29  ;;  %731 = vmatpush3.bf16.msra.mxu1 %v749_v29 }
  0x1e   :  { %699 = vmatprep.subr.bf16.mxu0 %v750_v32  ;;  %724 = vmatprep.subr.bf16.mxu1 %v750_v32 }
  0x20   :  { %387 = vadd.xlane.f32.xlu1 %v356_v30  ;;  %385 = vadd.xlane.f32.xlu0 %v355_v31 }
  0x21   :  { %700 = vmatpush3.bf16.msra.mxu0 %v750_v32  ;;  %732 = vmatpush3.bf16.msra.mxu1 %v750_v32 }
  0x24   :  { %702 = vmatmul.mubr.bf16.vlgmr.msra.gmra.mrb[0].mxu0 %v818_v0  ;;  %710 = vmatmul.mubr.bf16.vlgmr.msra.gmra.mrb[0].mxu1 %v63_v20 }
  0x25   :  { %705 = vmatprep.mubr.bf16.mxu0 %v843_v5  ;;  %713 = vmatprep.mubr.bf16.mxu1 %v65_v24  ;;  %v340_v24 = vld [vmem:[#allocation3 + $0x78] sm:$0xff] }
  0x2c   :  { %706 = vmatmul.mubr.bf16.gmra.mrb[4].mxu0 %v859_v12  ;;  %714 = vmatmul.mubr.bf16.gmra.mrb[4].mxu1 %v67_v28 }
  0x91   :  { %v362_v36 = vpop.xlane.xlu1 %361  ;;  %v358_v37 = vpop.xlane.xlu0 %357 }
  0x92   :  { %v391_v38 = vadd.f32 %v362_v36, %v327_v34  ;;  %v389_v39 = vadd.f32 %v358_v37, %v325_v35 }
  0x94   :  { %408 = vst.msk [vmem:[#allocation3 + $0x10] sm:$0xff] %vm35_vm0, %v391_v38  ;;  %406 = vst.msk [vmem:[#allocation3] sm:$0xff] %vm35_vm0, %v389_v39 }
  0x95   :  { %v364_v42 = vpop.xlane.xlu1 %363  ;;  %v360_v43 = vpop.xlane.xlu0 %359 }
  0x96   :  { %v392_v44 = vadd.f32 %v364_v42, %v328_v40  ;;  %v390_v45 = vadd.f32 %v360_v43, %v326_v41 }
  0x98   :  { %409 = vst.msk [vmem:[#allocation3 + $0x18] sm:$0xff] %vm35_vm0, %v392_v44  ;;  %407 = vst.msk [vmem:[#allocation3 + $0x8] sm:$0xff] %vm35_vm0, %v390_v45 }
  0x99   :  { %v368_v48 = vpop.xlane.xlu1 %367  ;;  %v366_v49 = vpop.xlane.xlu0 %365 }
  0x9a   :  { %v394_v50 = vadd.f32 %v368_v48, %v330_v46  ;;  %v393_v51 = vadd.f32 %v366_v49, %v329_v47 }
  0x9b   :  { %v425_v53 = vld [vmem:[#allocation3] sm:$0xff]  ;;  %v427_v58 = vld [vmem:[#allocation3 + $0x10] sm:$0xff] }
  0x9c   :  { %411 = vst.msk [vmem:[#allocation3 + $0x28] sm:$0xff] %vm35_vm0, %v394_v50  ;;  %410 = vst.msk [vmem:[#allocation3 + $0x20] sm:$0xff] %vm35_vm0, %v393_v51  ;;  %v441_v55 = vmax.f32 %v425_v53, 1.0  ;;  %v443_v1 = vmax.f32 %v427_v58, 1.0 }
  0x9d   :  { %v372_v56 = vpop.xlane.xlu1 %371  ;;  %v370_v57 = vpop.xlane.xlu0 %369 }
  0x9e   :  { %v396_v59 = vadd.f32 %v372_v56, %v332_v52  ;;  %761 = vrcp.f32 %v441_v55  ;;  %v395_v60 = vadd.f32 %v370_v57, %v331_v54 }
  0x9f   :  { %v426_v62 = vld [vmem:[#allocation3 + $0x8] sm:$0xff]  ;;  %v428_v4 = vld [vmem:[#allocation3 + $0x18] sm:$0xff] }
  0xa0   :  { %413 = vst.msk [vmem:[#allocation3 + $0x38] sm:$0xff] %vm35_vm0, %v396_v59  ;;  %412 = vst.msk [vmem:[#allocation3 + $0x30] sm:$0xff] %vm35_vm0, %v395_v60  ;;  %v442_v0 = vmax.f32 %v426_v62, 1.0  ;;  %v444_v9 = vmax.f32 %v428_v4, 1.0 }
  0xa1   :  { %v376_v2 = vpop.xlane.xlu1 %375  ;;  %v374_v3 = vpop.xlane.xlu0 %373 }
  0xa2   :  { %v398_v5 = vadd.f32 %v376_v2, %v334_v61  ;;  %763 = vrcp.f32 %v442_v0  ;;  %v397_v6 = vadd.f32 %v374_v3, %v333_v63 }
  0xa3   :  { %765 = vrcp.f32 %v443_v1  ;;  %v429_v12 = vld [vmem:[#allocation3 + $0x20] sm:$0xff]  ;;  %v430_v21 = vld [vmem:[#allocation3 + $0x28] sm:$0xff] }
  0xa4   :  { %415 = vst.msk [vmem:[#allocation3 + $0x48] sm:$0xff] %vm35_vm0, %v398_v5  ;;  %414 = vst.msk [vmem:[#allocation3 + $0x40] sm:$0xff] %vm35_vm0, %v397_v6  ;;  %767 = vrcp.f32 %v444_v9  ;;  %v445_v18 = vmax.f32 %v429_v12, 1.0  ;;  %v446_v29 = vmax.f32 %v430_v21, 1.0 }
  0xa5   :  { %v380_v10 = vpop.xlane.xlu1 %379  ;;  %v378_v11 = vpop.xlane.xlu0 %377 }
  0xa6   :  { %v400_v13 = vadd.f32 %v380_v10, %v336_v7  ;;  %v399_v14 = vadd.f32 %v378_v11, %v335_v8  ;;  %769 = vrcp.f32 %v445_v18 }
  0xa7   :  { %v431_v32 = vld [vmem:[#allocation3 + $0x30] sm:$0xff]  ;;  %v432_v39 = vld [vmem:[#allocation3 + $0x38] sm:$0xff] }
  0xa8   :  { %v762_v17 = vpop.eup %761  ;;  %417 = vst.msk [vmem:[#allocation3 + $0x58] sm:$0xff] %vm35_vm0, %v400_v13  ;;  %416 = vst.msk [vmem:[#allocation3 + $0x50] sm:$0xff] %vm35_vm0, %v399_v14  ;;  %v447_v38 = vmax.f32 %v431_v32, 1.0  ;;  %v448_v43 = vmax.f32 %v432_v39, 1.0 }
  0xa9   :  { %v384_v19 = vpop.xlane.xlu1 %383  ;;  %523 = vperm.xlu0 %735, %v762_v17   ;;  %v382_v20 = vpop.xlane.xlu0 %381 }
  0xaa   :  { %v402_v22 = vadd.f32 %v384_v19, %v338_v15  ;;  %v401_v23 = vadd.f32 %v382_v20, %v337_v16  ;;  %v489_v19 = vld [vmem:[%s1020_s2] sm:$0xff] }
  0xab   :  { %v434_v25 = vld [vmem:[#allocation3 + $0x48] sm:$0xff]  ;;  %v433_v44 = vld [vmem:[#allocation3 + $0x40] sm:$0xff] }
  0xac   :  { %v764_v27 = vpop.eup %763  ;;  %419 = vst.msk [vmem:[#allocation3 + $0x68] sm:$0xff] %vm35_vm0, %v402_v22  ;;  %v450_v28 = vmax.f32 %v434_v25, 1.0  ;;  %418 = vst.msk [vmem:[#allocation3 + $0x60] sm:$0xff] %vm35_vm0, %v401_v23  ;;  %v449_v49 = vmax.f32 %v433_v44, 1.0  ;;  %v490_v23 = vld [vmem:[%s1020_s2 + $0x8] sm:$0xff] }
  0xad   :  { %v388_v30 = vpop.xlane.xlu1 %387  ;;  %528 = vperm.xlu1 %736, %v764_v27   ;;  %v386_v31 = vpop.xlane.xlu0 %385  ;;  %v494_v44 = vld [vmem:[%s1020_s2 + $0x28] sm:$0xff] }
  0xae   :  { %v766_v33 = vpop.eup %765  ;;  %v404_v34 = vadd.f32 %v388_v30, %v340_v24  ;;  %771 = vrcp.f32 %v450_v28  ;;  %v403_v35 = vadd.f32 %v386_v31, %v339_v26  ;;  %v491_v26 = vld [vmem:[%s1020_s2 + $0x10] sm:$0xff]  ;;  %v492_v30 = vld [vmem:[%s1020_s2 + $0x18] sm:$0xff] }
  0xaf   :  { %v436_v36 = vld [vmem:[#allocation3 + $0x58] sm:$0xff]  ;;  %773 = vrcp.f32 %v446_v29  ;;  %v768_v40 = vpop.eup %767  ;;  %v435_v50 = vld [vmem:[#allocation3 + $0x50] sm:$0xff] }
  0xb0   :  { %421 = vst.msk [vmem:[#allocation3 + $0x78] sm:$0xff] %vm35_vm0, %v404_v34  ;;  %v452_v37 = vmax.f32 %v436_v36, 1.0  ;;  %420 = vst.msk [vmem:[#allocation3 + $0x70] sm:$0xff] %vm35_vm0, %v403_v35  ;;  %v770_v45 = vpop.eup %769  ;;  %v451_v53 = vmax.f32 %v435_v50, 1.0  ;;  %v493_v36 = vld [vmem:[%s1020_s2 + $0x20] sm:$0xff]  ;;  %v495_v50 = vld [vmem:[%s1020_s2 + $0x30] sm:$0xff] }
  0xb1   :  { %533 = vperm.xlu1 %736, %v766_v33  }
  0xb2   :  { %775 = vrcp.f32 %v452_v37  ;;  %v498_v37 = vld [vmem:[%s1020_s2 + $0x48] sm:$0xff] }
  0xb3   :  { %v438_v41 = vld [vmem:[#allocation3 + $0x68] sm:$0xff]  ;;  %777 = vrcp.f32 %v447_v38  ;;  %v437_v54 = vld [vmem:[#allocation3 + $0x60] sm:$0xff] }
  0xb4   :  { %v454_v42 = vmax.f32 %v438_v41, 1.0  ;;  %v453_v57 = vmax.f32 %v437_v54, 1.0 }
  0xb5   :  { %538 = vperm.xlu1 %736, %v768_v40  }
  0xb6   :  { %779 = vrcp.f32 %v454_v42 }
  0xb7   :  { %v440_v46 = vld [vmem:[#allocation3 + $0x78] sm:$0xff]  ;;  %781 = vrcp.f32 %v448_v43  ;;  %v439_v58 = vld [vmem:[#allocation3 + $0x70] sm:$0xff] }
  0xb8   :  { %v772_v47 = vpop.eup %771  ;;  %v456_v48 = vmax.f32 %v440_v46, 1.0  ;;  %v455_v61 = vmax.f32 %v439_v58, 1.0  ;;  %v496_v58 = vld [vmem:[%s1020_s2 + $0x38] sm:$0xff] }
  0xb9   :  { %568 = vperm.xlu0 %735, %v772_v47   ;;  %543 = vperm.xlu1 %736, %v770_v45   ;;  %v774_v51 = vpop.eup %773  ;;  %v500_v45 = vld [vmem:[%s1020_s2 + $0x58] sm:$0xff] }
  0xba   :  { %783 = vrcp.f32 %v456_v48 }
  0xbb   :  { %785 = vrcp.f32 %v449_v49 }
  0xbc   :  { %v776_v52 = vpop.eup %775  ;;  %787 = vrcp.f32 %v451_v53  ;;  %v502_v53 = vld [vmem:[%s1020_s2 + $0x68] sm:$0xff] }
  0xbd   :  { %578 = vperm.xlu0 %735, %v776_v52   ;;  %548 = vperm.xlu1 %736, %v774_v51   ;;  %v778_v55 = vpop.eup %777  ;;  %789 = vrcp.f32 %v453_v57 }
  0xbe   :  { %791 = vrcp.f32 %v455_v61 }
  0xc0   :  { %v780_v56 = vpop.eup %779 }
  0xc1   :  { %588 = vperm.xlu0 %735, %v780_v56   ;;  %553 = vperm.xlu1 %736, %v778_v55   ;;  %v782_v59 = vpop.eup %781 }
  0xc4   :  { %v784_v60 = vpop.eup %783 }
  0xc5   :  { %598 = vperm.xlu0 %735, %v784_v60   ;;  %558 = vperm.xlu1 %736, %v782_v59   ;;  %v786_v62 = vpop.eup %785  ;;  %v504_v60 = vld [vmem:[%s1020_s2 + $0x78] sm:$0xff] }
  0xc6   :  { %v788_v63 = vpop.eup %787 }
  0xc7   :  { %v790_v0 = vpop.eup %789 }
  0xc8   :  { %v792_v1 = vpop.eup %791 }
  0xc9   :  { %563 = vperm.xlu1 %736, %v786_v62  }
  0xcd   :  { %573 = vperm.xlu1 %736, %v788_v63  }
  0xd1   :  { %583 = vperm.xlu1 %736, %v790_v0  }
  0xd5   :  { %593 = vperm.xlu1 %736, %v792_v1  }
  0xf7   :  { %v703_v2 = vpop.f32.mrb[0].mxu0  ;;  %v910_v3 = vpop.f32.mrb[0].mxu1 }
  0xf8   :  { %v230_v4 = vpop.f32.mrb[1].mxu0  ;;  %v912_v5 = vpop.f32.mrb[1].mxu1 }
  0xf9   :  { %v704_v6 = vpop.f32.mrb[2].mxu0  ;;  %v712_v7 = vpop.f32.mrb[2].mxu1 }
  0xfa   :  { %v233_v8 = vpop.f32.mrb[3].mxu0  ;;  %v265_v9 = vpop.f32.mrb[3].mxu1 }
  0xff   :  { %v707_v10 = vpop.f32.mrb[4].mxu0  ;;  %v914_v11 = vpop.f32.mrb[4].mxu1 }
 0x100   :  { %v246_v12 = vpop.f32.mrb[5].mxu0  ;;  %v916_v13 = vpop.f32.mrb[5].mxu1 }
 0x101   :  { %v708_v14 = vpop.f32.mrb[6].mxu0  ;;  %v716_v15 = vpop.f32.mrb[6].mxu1 }
 0x102   :  { %v249_v16 = vpop.f32.mrb[7].mxu0  ;;  %v281_v17 = vpop.f32.mrb[7].mxu1 }
 0x128   :  { %v524_v18 = vpop.permute.xlu0 %523 }
 0x129   :  { %v601_v20 = vmul.f32 %v524_v18, %v230_v4 }
 0x12b   :  { %v617_v21 = vadd.f32 %v601_v20, %v489_v19 }
 0x12c   :  { %v529_v22 = vpop.permute.xlu1 %528 }
 0x12d   :  { %633 = vst [vmem:[%s1021_s3] sm:$0xff] %v617_v21  ;;  %v602_v24 = vmul.f32 %v529_v22, %v233_v8  ;;  %v499_v8 = vld [vmem:[%s1020_s2 + $0x50] sm:$0xff] }
 0x12f   :  { %v618_v25 = vadd.f32 %v602_v24, %v490_v23 }
 0x130   :  { %v534_v27 = vpop.permute.xlu1 %533 }
 0x131   :  { %634 = vst [vmem:[%s1021_s3 + $0x8] sm:$0xff] %v618_v25  ;;  %v603_v28 = vmul.f32 %v703_v2, %v534_v27  ;;  %v497_v2 = vld [vmem:[%s1020_s2 + $0x40] sm:$0xff] }
 0x133   :  { %v619_v29 = vadd.f32 %v603_v28, %v491_v26 }
 0x134   :  { %v539_v31 = vpop.permute.xlu1 %538 }
 0x135   :  { %635 = vst [vmem:[%s1021_s3 + $0x10] sm:$0xff] %v619_v29  ;;  %v604_v32 = vmul.f32 %v704_v6, %v539_v31 }
 0x137   :  { %v620_v33 = vadd.f32 %v604_v32, %v492_v30 }
 0x138   :  { %v544_v34 = vpop.permute.xlu1 %543  ;;  %v569_v35 = vpop.permute.xlu0 %568 }
 0x139   :  { %636 = vst [vmem:[%s1021_s3 + $0x18] sm:$0xff] %v620_v33  ;;  %v605_v38 = vmul.f32 %v544_v34, %v246_v12  ;;  %v610_v39 = vmul.f32 %v569_v35, %v265_v9 }
 0x13b   :  { %v621_v40 = vadd.f32 %v605_v38, %v493_v36  ;;  %v626_v41 = vadd.f32 %v610_v39, %v498_v37 }
 0x13c   :  { %v549_v42 = vpop.permute.xlu1 %548  ;;  %v579_v43 = vpop.permute.xlu0 %578 }
 0x13d   :  { %637 = vst [vmem:[%s1021_s3 + $0x20] sm:$0xff] %v621_v40  ;;  %v606_v46 = vmul.f32 %v549_v42, %v249_v16  ;;  %v612_v47 = vmul.f32 %v712_v7, %v579_v43  ;;  %642 = vst [vmem:[%s1021_s3 + $0x48] sm:$0xff] %v626_v41 }
 0x13f   :  { %v622_v48 = vadd.f32 %v606_v46, %v494_v44  ;;  %v628_v49 = vadd.f32 %v612_v47, %v500_v45 }
 0x140   :  { %v554_v51 = vpop.permute.xlu1 %553  ;;  %v589_v52 = vpop.permute.xlu0 %588 }
 0x141   :  { %638 = vst [vmem:[%s1021_s3 + $0x28] sm:$0xff] %v622_v48  ;;  %644 = vst [vmem:[%s1021_s3 + $0x58] sm:$0xff] %v628_v49  ;;  %v607_v54 = vmul.f32 %v707_v10, %v554_v51  ;;  %v614_v55 = vmul.f32 %v589_v52, %v281_v17  ;;  %v503_v17 = vld [vmem:[%s1020_s2 + $0x70] sm:$0xff] }
 0x143   :  { %v623_v56 = vadd.f32 %v607_v54, %v495_v50  ;;  %v630_v57 = vadd.f32 %v614_v55, %v502_v53 }
 0x144   :  { %v559_v59 = vpop.permute.xlu1 %558  ;;  %v599_v61 = vpop.permute.xlu0 %598 }
 0x145   :  { %639 = vst [vmem:[%s1021_s3 + $0x30] sm:$0xff] %v623_v56  ;;  %646 = vst [vmem:[%s1021_s3 + $0x68] sm:$0xff] %v630_v57  ;;  %v608_v62 = vmul.f32 %v708_v14, %v559_v59  ;;  %v616_v63 = vmul.f32 %v716_v15, %v599_v61  ;;  %v501_v14 = vld [vmem:[%s1020_s2 + $0x60] sm:$0xff] }
 0x147   :  { %v624_v0 = vadd.f32 %v608_v62, %v496_v58  ;;  %v632_v1 = vadd.f32 %v616_v63, %v504_v60 }
 0x148   :  { %v564_v4 = vpop.permute.xlu1 %563 }
 0x149   :  { %640 = vst [vmem:[%s1021_s3 + $0x38] sm:$0xff] %v624_v0  ;;  %648 = vst [vmem:[%s1021_s3 + $0x78] sm:$0xff] %v632_v1  ;;  %v609_v6 = vmul.f32 %v564_v4, %v912_v5 }
 0x14b   :  { %v625_v7 = vadd.f32 %v609_v6, %v497_v2 }
 0x14c   :  { %v574_v9 = vpop.permute.xlu1 %573 }
 0x14d   :  { %641 = vst [vmem:[%s1021_s3 + $0x40] sm:$0xff] %v625_v7  ;;  %v611_v10 = vmul.f32 %v910_v3, %v574_v9 }
 0x14f   :  { %v627_v12 = vadd.f32 %v611_v10, %v499_v8 }
 0x150   :  { %v584_v15 = vpop.permute.xlu1 %583 }
 0x151   :  { %643 = vst [vmem:[%s1021_s3 + $0x50] sm:$0xff] %v627_v12  ;;  %v613_v5 = vmul.f32 %v584_v15, %v916_v13 }
 0x153   :  { %v629_v16 = vadd.f32 %v613_v5, %v501_v14 }
 0x154   :  { %v594_v18 = vpop.permute.xlu1 %593 }
 0x155   :  { %645 = vst [vmem:[%s1021_s3 + $0x60] sm:$0xff] %v629_v16  ;;  %v615_v3 = vmul.f32 %v914_v11, %v594_v18 }
 0x157   :  { %v631_v19 = vadd.f32 %v615_v3, %v503_v17 }
 0x159   :  { %647 = vst [vmem:[%s1021_s3 + $0x70] sm:$0xff] %v631_v19 }

// kernel: model_graphsage_forward.5
= control target key start
LH: loop header
LB: loop body
LE: loop exit
PB: predicated region body
PF: predicated region fallthrough
CT: control target
= control target key end

     0   :  { %vm35_vm0 = vcmask 7168   ;;  %v809_v2 = vmov 0.0   ;;  %v810_v33 = vmov 0   ;;  %s1040_s0 = inlined_call_operand.vmem [shape: bf16[128,128], index: 0, kind: input, shape index: {}]   ;;  %s1041_s1 = inlined_call_operand.vmem [shape: bf16[128,128], index: 1, kind: input, shape index: {}]   ;;  %s1042_s2 = inlined_call_operand.vmem [shape: f32[128,128], index: 2, kind: input, shape index: {}]   ;;  %s1043_s3 = inlined_call_operand.vmem [shape: f32[128,128], index: 3, kind: output, shape index: {}]  }
   0x1   :  { %v834_v0 = vld [vmem:[%s1040_s0 + $0x8] sm:$0xff]   ;;  %v52_v1 = vld [vmem:[%s1040_s0] sm:$0xff]   ;;  %38 = vst.msk [vmem:[#allocation3 + $0x10] sm:$0xff] %vm35_vm0, %v809_v2  ;;  %36 = vst.msk [vmem:[#allocation3] sm:$0xff] %vm35_vm0, %v809_v2  ;;  %751 = vset.pattern.permute.xlu0 %v810_v33  ;;  %752 = vset.pattern.permute.xlu1 %v810_v33 }
   0x2   :  { %37 = vst.msk [vmem:[#allocation3 + $0x8] sm:$0xff] %vm35_vm0, %v809_v2  ;;  %39 = vst.msk [vmem:[#allocation3 + $0x18] sm:$0xff] %vm35_vm0, %v809_v2  ;;  %v343_v3 = vunpack.c.l.bf16 %v834_v0  ;;  %v341_v4 = vunpack.c.l.bf16 %v52_v1  ;;  %v859_v5 = vld [vmem:[%s1040_s0 + $0x10] sm:$0xff]   ;;  %v344_v6 = vunpack.c.h.bf16 %v834_v0  ;;  %v342_v7 = vunpack.c.h.bf16 %v52_v1  ;;  %v759_v8 = vld [vmem:[%s1041_s1] sm:$0xff]   ;;  %717 = vmatprep.mubr.bf16.mxu0 %v52_v1 }
   0x3   :  { %40 = vst.msk [vmem:[#allocation3 + $0x20] sm:$0xff] %vm35_vm0, %v809_v2  ;;  %41 = vst.msk [vmem:[#allocation3 + $0x28] sm:$0xff] %vm35_vm0, %v809_v2  ;;  %v760_v9 = vld [vmem:[%s1041_s1 + $0x8] sm:$0xff]   ;;  %v61_v10 = vld [vmem:[%s1040_s0 + $0x20] sm:$0xff]   ;;  %701 = vmatprep.subr.bf16.mxu0 %v759_v8  ;;  %733 = vmatprep.subr.bf16.mxu1 %v759_v8  ;;  %v346_v11 = vunpack.c.h.bf16 %v859_v5  ;;  %v345_v13 = vunpack.c.l.bf16 %v859_v5 }
   0x4   :  { %42 = vst.msk [vmem:[#allocation3 + $0x30] sm:$0xff] %vm35_vm0, %v809_v2  ;;  %43 = vst.msk [vmem:[#allocation3 + $0x38] sm:$0xff] %vm35_vm0, %v809_v2  ;;  %361 = vadd.xlane.f32.xlu1 %v343_v3  ;;  %357 = vadd.xlane.f32.xlu0 %v341_v4  ;;  %v875_v12 = vld [vmem:[%s1040_s0 + $0x18] sm:$0xff]   ;;  %v761_v14 = vld [vmem:[%s1041_s1 + $0x10] sm:$0xff]   ;;  %v350_v18 = vunpack.c.h.bf16 %v61_v10  ;;  %v349_v19 = vunpack.c.l.bf16 %v61_v10 }
   0x5   :  { %44 = vst.msk [vmem:[#allocation3 + $0x40] sm:$0xff] %vm35_vm0, %v809_v2  ;;  %45 = vst.msk [vmem:[#allocation3 + $0x48] sm:$0xff] %vm35_vm0, %v809_v2  ;;  %702 = vmatpush3.bf16.msra.mxu0 %v759_v8  ;;  %741 = vmatpush3.bf16.msra.mxu1 %v759_v8  ;;  %v348_v15 = vunpack.c.h.bf16 %v875_v12  ;;  %v347_v16 = vunpack.c.l.bf16 %v875_v12  ;;  %v762_v17 = vld [vmem:[%s1041_s1 + $0x18] sm:$0xff]   ;;  %v63_v20 = vld [vmem:[%s1040_s0 + $0x28] sm:$0xff]  }
   0x6   :  { %46 = vst.msk [vmem:[#allocation3 + $0x50] sm:$0xff] %vm35_vm0, %v809_v2  ;;  %47 = vst.msk [vmem:[#allocation3 + $0x58] sm:$0xff] %vm35_vm0, %v809_v2  ;;  %703 = vmatprep.subr.bf16.mxu0 %v760_v9  ;;  %734 = vmatprep.subr.bf16.mxu1 %v760_v9  ;;  %v763_v21 = vld [vmem:[%s1041_s1 + $0x20] sm:$0xff]   ;;  %v352_v22 = vunpack.c.h.bf16 %v63_v20  ;;  %v351_v23 = vunpack.c.l.bf16 %v63_v20  ;;  %v65_v24 = vld [vmem:[%s1040_s0 + $0x30] sm:$0xff]  }
   0x7   :  { %48 = vst.msk [vmem:[#allocation3 + $0x60] sm:$0xff] %vm35_vm0, %v809_v2  ;;  %49 = vst.msk [vmem:[#allocation3 + $0x68] sm:$0xff] %vm35_vm0, %v809_v2  ;;  %725 = vmatprep.mubr.bf16.mxu1 %v61_v10  ;;  %v764_v25 = vld [vmem:[%s1041_s1 + $0x28] sm:$0xff]   ;;  %v354_v26 = vunpack.c.h.bf16 %v65_v24  ;;  %v353_v27 = vunpack.c.l.bf16 %v65_v24  ;;  %v67_v28 = vld [vmem:[%s1040_s0 + $0x38] sm:$0xff]  }
   0x8   :  { %50 = vst.msk [vmem:[#allocation3 + $0x70] sm:$0xff] %vm35_vm0, %v809_v2  ;;  %51 = vst.msk [vmem:[#allocation3 + $0x78] sm:$0xff] %vm35_vm0, %v809_v2  ;;  %363 = vadd.xlane.f32.xlu1 %v344_v6  ;;  %359 = vadd.xlane.f32.xlu0 %v342_v7  ;;  %v765_v29 = vld [vmem:[%s1041_s1 + $0x30] sm:$0xff]   ;;  %v356_v30 = vunpack.c.h.bf16 %v67_v28  ;;  %v355_v31 = vunpack.c.l.bf16 %v67_v28  ;;  %v766_v32 = vld [vmem:[%s1041_s1 + $0x38] sm:$0xff]  }
   0x9   :  { %704 = vmatpush3.bf16.msra.mxu0 %v760_v9  ;;  %742 = vmatpush3.bf16.msra.mxu1 %v760_v9  ;;  %v327_v34 = vld [vmem:[#allocation3 + $0x10] sm:$0xff]  ;;  %v325_v35 = vld [vmem:[#allocation3] sm:$0xff]  ;;  %v328_v40 = vld [vmem:[#allocation3 + $0x18] sm:$0xff] }
   0xa   :  { %705 = vmatprep.subr.bf16.mxu0 %v761_v14  ;;  %735 = vmatprep.subr.bf16.mxu1 %v761_v14  ;;  %v326_v41 = vld [vmem:[#allocation3 + $0x8] sm:$0xff]  ;;  %v329_v47 = vld [vmem:[#allocation3 + $0x20] sm:$0xff] }
   0xb   :  { %v330_v46 = vld [vmem:[#allocation3 + $0x28] sm:$0xff]  ;;  %v332_v52 = vld [vmem:[#allocation3 + $0x38] sm:$0xff]  ;;  %v331_v54 = vld [vmem:[#allocation3 + $0x30] sm:$0xff] }
   0xc   :  { %367 = vadd.xlane.f32.xlu1 %v346_v11  ;;  %365 = vadd.xlane.f32.xlu0 %v345_v13  ;;  %v334_v61 = vld [vmem:[#allocation3 + $0x48] sm:$0xff]  ;;  %v333_v63 = vld [vmem:[#allocation3 + $0x40] sm:$0xff] }
   0xd   :  { %706 = vmatpush3.bf16.msra.mxu0 %v761_v14  ;;  %743 = vmatpush3.bf16.msra.mxu1 %v761_v14  ;;  %v336_v7 = vld [vmem:[#allocation3 + $0x58] sm:$0xff]  ;;  %v335_v8 = vld [vmem:[#allocation3 + $0x50] sm:$0xff] }
   0xe   :  { %707 = vmatprep.subr.bf16.mxu0 %v762_v17  ;;  %736 = vmatprep.subr.bf16.mxu1 %v762_v17 }
  0x10   :  { %371 = vadd.xlane.f32.xlu1 %v348_v15  ;;  %369 = vadd.xlane.f32.xlu0 %v347_v16  ;;  %v338_v15 = vld [vmem:[#allocation3 + $0x68] sm:$0xff]  ;;  %v337_v16 = vld [vmem:[#allocation3 + $0x60] sm:$0xff] }
  0x11   :  { %708 = vmatpush3.bf16.msra.mxu0 %v762_v17  ;;  %744 = vmatpush3.bf16.msra.mxu1 %v762_v17 }
  0x12   :  { %709 = vmatprep.subr.bf16.mxu0 %v763_v21  ;;  %737 = vmatprep.subr.bf16.mxu1 %v763_v21 }
  0x14   :  { %375 = vadd.xlane.f32.xlu1 %v350_v18  ;;  %373 = vadd.xlane.f32.xlu0 %v349_v19 }
  0x15   :  { %710 = vmatpush3.bf16.msra.mxu0 %v763_v21  ;;  %745 = vmatpush3.bf16.msra.mxu1 %v763_v21 }
  0x16   :  { %711 = vmatprep.subr.bf16.mxu0 %v764_v25  ;;  %738 = vmatprep.subr.bf16.mxu1 %v764_v25 }
  0x18   :  { %379 = vadd.xlane.f32.xlu1 %v352_v22  ;;  %377 = vadd.xlane.f32.xlu0 %v351_v23 }
  0x19   :  { %712 = vmatpush3.bf16.msra.mxu0 %v764_v25  ;;  %746 = vmatpush3.bf16.msra.mxu1 %v764_v25 }
  0x1a   :  { %713 = vmatprep.subr.bf16.mxu0 %v765_v29  ;;  %739 = vmatprep.subr.bf16.mxu1 %v765_v29 }
  0x1c   :  { %383 = vadd.xlane.f32.xlu1 %v354_v26  ;;  %381 = vadd.xlane.f32.xlu0 %v353_v27  ;;  %v339_v26 = vld [vmem:[#allocation3 + $0x70] sm:$0xff] }
  0x1d   :  { %714 = vmatpush3.bf16.msra.mxu0 %v765_v29  ;;  %747 = vmatpush3.bf16.msra.mxu1 %v765_v29 }
  0x1e   :  { %715 = vmatprep.subr.bf16.mxu0 %v766_v32  ;;  %740 = vmatprep.subr.bf16.mxu1 %v766_v32 }
  0x20   :  { %387 = vadd.xlane.f32.xlu1 %v356_v30  ;;  %385 = vadd.xlane.f32.xlu0 %v355_v31 }
  0x21   :  { %716 = vmatpush3.bf16.msra.mxu0 %v766_v32  ;;  %748 = vmatpush3.bf16.msra.mxu1 %v766_v32 }
  0x24   :  { %718 = vmatmul.mubr.bf16.vlgmr.msra.gmra.mrb[0].mxu0 %v834_v0  ;;  %726 = vmatmul.mubr.bf16.vlgmr.msra.gmra.mrb[0].mxu1 %v63_v20 }
  0x25   :  { %721 = vmatprep.mubr.bf16.mxu0 %v859_v5  ;;  %729 = vmatprep.mubr.bf16.mxu1 %v65_v24  ;;  %v340_v24 = vld [vmem:[#allocation3 + $0x78] sm:$0xff] }
  0x2c   :  { %722 = vmatmul.mubr.bf16.gmra.mrb[4].mxu0 %v875_v12  ;;  %730 = vmatmul.mubr.bf16.gmra.mrb[4].mxu1 %v67_v28 }
  0x91   :  { %v362_v36 = vpop.xlane.xlu1 %361  ;;  %v358_v37 = vpop.xlane.xlu0 %357 }
  0x92   :  { %v391_v38 = vadd.f32 %v362_v36, %v327_v34  ;;  %v389_v39 = vadd.f32 %v358_v37, %v325_v35 }
  0x94   :  { %408 = vst.msk [vmem:[#allocation3 + $0x10] sm:$0xff] %vm35_vm0, %v391_v38  ;;  %406 = vst.msk [vmem:[#allocation3] sm:$0xff] %vm35_vm0, %v389_v39 }
  0x95   :  { %v364_v42 = vpop.xlane.xlu1 %363  ;;  %v360_v43 = vpop.xlane.xlu0 %359 }
  0x96   :  { %v392_v44 = vadd.f32 %v364_v42, %v328_v40  ;;  %v390_v45 = vadd.f32 %v360_v43, %v326_v41 }
  0x98   :  { %409 = vst.msk [vmem:[#allocation3 + $0x18] sm:$0xff] %vm35_vm0, %v392_v44  ;;  %407 = vst.msk [vmem:[#allocation3 + $0x8] sm:$0xff] %vm35_vm0, %v390_v45 }
  0x99   :  { %v368_v48 = vpop.xlane.xlu1 %367  ;;  %v366_v49 = vpop.xlane.xlu0 %365 }
  0x9a   :  { %v394_v50 = vadd.f32 %v368_v48, %v330_v46  ;;  %v393_v51 = vadd.f32 %v366_v49, %v329_v47 }
  0x9b   :  { %v425_v53 = vld [vmem:[#allocation3] sm:$0xff]  ;;  %v427_v58 = vld [vmem:[#allocation3 + $0x10] sm:$0xff] }
  0x9c   :  { %411 = vst.msk [vmem:[#allocation3 + $0x28] sm:$0xff] %vm35_vm0, %v394_v50  ;;  %410 = vst.msk [vmem:[#allocation3 + $0x20] sm:$0xff] %vm35_vm0, %v393_v51  ;;  %v441_v55 = vmax.f32 %v425_v53, 1.0  ;;  %v443_v1 = vmax.f32 %v427_v58, 1.0 }
  0x9d   :  { %v372_v56 = vpop.xlane.xlu1 %371  ;;  %v370_v57 = vpop.xlane.xlu0 %369 }
  0x9e   :  { %v396_v59 = vadd.f32 %v372_v56, %v332_v52  ;;  %777 = vrcp.f32 %v441_v55  ;;  %v395_v60 = vadd.f32 %v370_v57, %v331_v54 }
  0x9f   :  { %v426_v62 = vld [vmem:[#allocation3 + $0x8] sm:$0xff]  ;;  %v428_v4 = vld [vmem:[#allocation3 + $0x18] sm:$0xff] }
  0xa0   :  { %413 = vst.msk [vmem:[#allocation3 + $0x38] sm:$0xff] %vm35_vm0, %v396_v59  ;;  %412 = vst.msk [vmem:[#allocation3 + $0x30] sm:$0xff] %vm35_vm0, %v395_v60  ;;  %v442_v0 = vmax.f32 %v426_v62, 1.0  ;;  %v444_v9 = vmax.f32 %v428_v4, 1.0 }
  0xa1   :  { %v376_v2 = vpop.xlane.xlu1 %375  ;;  %v374_v3 = vpop.xlane.xlu0 %373 }
  0xa2   :  { %v398_v5 = vadd.f32 %v376_v2, %v334_v61  ;;  %779 = vrcp.f32 %v442_v0  ;;  %v397_v6 = vadd.f32 %v374_v3, %v333_v63 }
  0xa3   :  { %781 = vrcp.f32 %v443_v1  ;;  %v429_v12 = vld [vmem:[#allocation3 + $0x20] sm:$0xff]  ;;  %v430_v21 = vld [vmem:[#allocation3 + $0x28] sm:$0xff] }
  0xa4   :  { %415 = vst.msk [vmem:[#allocation3 + $0x48] sm:$0xff] %vm35_vm0, %v398_v5  ;;  %414 = vst.msk [vmem:[#allocation3 + $0x40] sm:$0xff] %vm35_vm0, %v397_v6  ;;  %783 = vrcp.f32 %v444_v9  ;;  %v445_v18 = vmax.f32 %v429_v12, 1.0  ;;  %v446_v29 = vmax.f32 %v430_v21, 1.0 }
  0xa5   :  { %v380_v10 = vpop.xlane.xlu1 %379  ;;  %v378_v11 = vpop.xlane.xlu0 %377 }
  0xa6   :  { %v400_v13 = vadd.f32 %v380_v10, %v336_v7  ;;  %v399_v14 = vadd.f32 %v378_v11, %v335_v8  ;;  %785 = vrcp.f32 %v445_v18 }
  0xa7   :  { %v431_v32 = vld [vmem:[#allocation3 + $0x30] sm:$0xff]  ;;  %v432_v39 = vld [vmem:[#allocation3 + $0x38] sm:$0xff] }
  0xa8   :  { %v778_v17 = vpop.eup %777  ;;  %417 = vst.msk [vmem:[#allocation3 + $0x58] sm:$0xff] %vm35_vm0, %v400_v13  ;;  %416 = vst.msk [vmem:[#allocation3 + $0x50] sm:$0xff] %vm35_vm0, %v399_v14  ;;  %v447_v38 = vmax.f32 %v431_v32, 1.0  ;;  %v448_v43 = vmax.f32 %v432_v39, 1.0  ;;  %v492_v32 = vld [vmem:[%s1042_s2 + $0x18] sm:$0xff]  ;;  %v493_v39 = vld [vmem:[%s1042_s2 + $0x20] sm:$0xff] }
  0xa9   :  { %v384_v19 = vpop.xlane.xlu1 %383  ;;  %523 = vperm.xlu0 %751, %v778_v17   ;;  %v382_v20 = vpop.xlane.xlu0 %381 }
  0xaa   :  { %v402_v22 = vadd.f32 %v384_v19, %v338_v15  ;;  %v401_v23 = vadd.f32 %v382_v20, %v337_v16  ;;  %v489_v19 = vld [vmem:[%s1042_s2] sm:$0xff] }
  0xab   :  { %v434_v25 = vld [vmem:[#allocation3 + $0x48] sm:$0xff]  ;;  %v433_v44 = vld [vmem:[#allocation3 + $0x40] sm:$0xff] }
  0xac   :  { %v780_v27 = vpop.eup %779  ;;  %419 = vst.msk [vmem:[#allocation3 + $0x68] sm:$0xff] %vm35_vm0, %v402_v22  ;;  %v450_v28 = vmax.f32 %v434_v25, 1.0  ;;  %418 = vst.msk [vmem:[#allocation3 + $0x60] sm:$0xff] %vm35_vm0, %v401_v23  ;;  %v449_v49 = vmax.f32 %v433_v44, 1.0  ;;  %v490_v23 = vld [vmem:[%s1042_s2 + $0x8] sm:$0xff] }
  0xad   :  { %v388_v30 = vpop.xlane.xlu1 %387  ;;  %528 = vperm.xlu1 %752, %v780_v27   ;;  %v386_v31 = vpop.xlane.xlu0 %385  ;;  %v491_v27 = vld [vmem:[%s1042_s2 + $0x10] sm:$0xff] }
  0xae   :  { %v782_v33 = vpop.eup %781  ;;  %v404_v34 = vadd.f32 %v388_v30, %v340_v24  ;;  %787 = vrcp.f32 %v450_v28  ;;  %v403_v35 = vadd.f32 %v386_v31, %v339_v26 }
  0xaf   :  { %v436_v36 = vld [vmem:[#allocation3 + $0x58] sm:$0xff]  ;;  %789 = vrcp.f32 %v446_v29  ;;  %v784_v40 = vpop.eup %783  ;;  %v435_v50 = vld [vmem:[#allocation3 + $0x50] sm:$0xff] }
  0xb0   :  { %421 = vst.msk [vmem:[#allocation3 + $0x78] sm:$0xff] %vm35_vm0, %v404_v34  ;;  %v452_v37 = vmax.f32 %v436_v36, 1.0  ;;  %420 = vst.msk [vmem:[#allocation3 + $0x70] sm:$0xff] %vm35_vm0, %v403_v35  ;;  %v786_v45 = vpop.eup %785  ;;  %v451_v53 = vmax.f32 %v435_v50, 1.0 }
  0xb1   :  { %533 = vperm.xlu1 %752, %v782_v33  }
  0xb2   :  { %791 = vrcp.f32 %v452_v37 }
  0xb3   :  { %v438_v41 = vld [vmem:[#allocation3 + $0x68] sm:$0xff]  ;;  %793 = vrcp.f32 %v447_v38  ;;  %v437_v54 = vld [vmem:[#allocation3 + $0x60] sm:$0xff] }
  0xb4   :  { %v454_v42 = vmax.f32 %v438_v41, 1.0  ;;  %v453_v57 = vmax.f32 %v437_v54, 1.0 }
  0xb5   :  { %538 = vperm.xlu1 %752, %v784_v40   ;;  %v498_v40 = vld [vmem:[%s1042_s2 + $0x48] sm:$0xff] }
  0xb6   :  { %795 = vrcp.f32 %v454_v42 }
  0xb7   :  { %v440_v46 = vld [vmem:[#allocation3 + $0x78] sm:$0xff]  ;;  %797 = vrcp.f32 %v448_v43  ;;  %v439_v58 = vld [vmem:[#allocation3 + $0x70] sm:$0xff] }
  0xb8   :  { %v788_v47 = vpop.eup %787  ;;  %v456_v48 = vmax.f32 %v440_v46, 1.0  ;;  %v455_v61 = vmax.f32 %v439_v58, 1.0 }
  0xb9   :  { %568 = vperm.xlu0 %751, %v788_v47   ;;  %543 = vperm.xlu1 %752, %v786_v45   ;;  %v790_v51 = vpop.eup %789 }
  0xba   :  { %799 = vrcp.f32 %v456_v48  ;;  %v494_v48 = vld [vmem:[%s1042_s2 + $0x28] sm:$0xff] }
  0xbb   :  { %801 = vrcp.f32 %v449_v49  ;;  %v500_v49 = vld [vmem:[%s1042_s2 + $0x58] sm:$0xff] }
  0xbc   :  { %v792_v52 = vpop.eup %791  ;;  %803 = vrcp.f32 %v451_v53 }
  0xbd   :  { %578 = vperm.xlu0 %751, %v792_v52   ;;  %548 = vperm.xlu1 %752, %v790_v51   ;;  %v794_v55 = vpop.eup %793  ;;  %805 = vrcp.f32 %v453_v57 }
  0xbe   :  { %807 = vrcp.f32 %v455_v61 }
  0xc0   :  { %v796_v56 = vpop.eup %795 }
  0xc1   :  { %588 = vperm.xlu0 %751, %v796_v56   ;;  %553 = vperm.xlu1 %752, %v794_v55   ;;  %v798_v59 = vpop.eup %797  ;;  %v495_v56 = vld [vmem:[%s1042_s2 + $0x30] sm:$0xff] }
  0xc4   :  { %v800_v60 = vpop.eup %799 }
  0xc5   :  { %598 = vperm.xlu0 %751, %v800_v60   ;;  %558 = vperm.xlu1 %752, %v798_v59   ;;  %v802_v62 = vpop.eup %801  ;;  %v502_v59 = vld [vmem:[%s1042_s2 + $0x68] sm:$0xff] }
  0xc6   :  { %v804_v63 = vpop.eup %803 }
  0xc7   :  { %v806_v0 = vpop.eup %805 }
  0xc8   :  { %v808_v1 = vpop.eup %807 }
  0xc9   :  { %563 = vperm.xlu1 %752, %v802_v62  }
  0xcd   :  { %573 = vperm.xlu1 %752, %v804_v63  }
  0xd1   :  { %583 = vperm.xlu1 %752, %v806_v0  }
  0xd5   :  { %593 = vperm.xlu1 %752, %v808_v1  }
  0xf7   :  { %v719_v2 = vpop.f32.mrb[0].mxu0  ;;  %v926_v3 = vpop.f32.mrb[0].mxu1 }
  0xf8   :  { %v230_v4 = vpop.f32.mrb[1].mxu0  ;;  %v928_v5 = vpop.f32.mrb[1].mxu1 }
  0xf9   :  { %v720_v6 = vpop.f32.mrb[2].mxu0  ;;  %v728_v7 = vpop.f32.mrb[2].mxu1 }
  0xfa   :  { %v233_v8 = vpop.f32.mrb[3].mxu0  ;;  %v265_v9 = vpop.f32.mrb[3].mxu1 }
  0xff   :  { %v723_v10 = vpop.f32.mrb[4].mxu0  ;;  %v930_v11 = vpop.f32.mrb[4].mxu1 }
 0x100   :  { %v246_v12 = vpop.f32.mrb[5].mxu0  ;;  %v932_v13 = vpop.f32.mrb[5].mxu1 }
 0x101   :  { %v934_v14 = vpop.f32.mrb[6].mxu0  ;;  %v936_v15 = vpop.f32.mrb[6].mxu1 }
 0x102   :  { %v249_v16 = vpop.f32.mrb[7].mxu0  ;;  %v281_v17 = vpop.f32.mrb[7].mxu1 }
 0x128   :  { %v524_v18 = vpop.permute.xlu0 %523 }
 0x129   :  { %v601_v20 = vmul.f32 %v524_v18, %v230_v4  ;;  %v497_v18 = vld [vmem:[%s1042_s2 + $0x40] sm:$0xff] }
 0x12b   :  { %v617_v21 = vadd.f32 %v601_v20, %v489_v19 }
 0x12c   :  { %v529_v22 = vpop.permute.xlu1 %528 }
 0x12d   :  { %v633_v24 = vmax.f32 %v617_v21, 0.0  ;;  %v602_v25 = vmul.f32 %v529_v22, %v233_v8  ;;  %v499_v22 = vld [vmem:[%s1042_s2 + $0x50] sm:$0xff] }
 0x12f   :  { %649 = vst [vmem:[%s1043_s3] sm:$0xff] %v633_v24  ;;  %v618_v26 = vadd.f32 %v602_v25, %v490_v23 }
 0x130   :  { %v534_v28 = vpop.permute.xlu1 %533 }
 0x131   :  { %v634_v29 = vmax.f32 %v618_v26, 0.0  ;;  %v603_v30 = vmul.f32 %v719_v2, %v534_v28  ;;  %v496_v2 = vld [vmem:[%s1042_s2 + $0x38] sm:$0xff]  ;;  %v501_v26 = vld [vmem:[%s1042_s2 + $0x60] sm:$0xff] }
 0x133   :  { %650 = vst [vmem:[%s1043_s3 + $0x8] sm:$0xff] %v634_v29  ;;  %v619_v31 = vadd.f32 %v603_v30, %v491_v27 }
 0x134   :  { %v539_v33 = vpop.permute.xlu1 %538 }
 0x135   :  { %v635_v34 = vmax.f32 %v619_v31, 0.0  ;;  %v604_v35 = vmul.f32 %v720_v6, %v539_v33  ;;  %v504_v6 = vld [vmem:[%s1042_s2 + $0x78] sm:$0xff] }
 0x137   :  { %651 = vst [vmem:[%s1043_s3 + $0x10] sm:$0xff] %v635_v34  ;;  %v620_v36 = vadd.f32 %v604_v35, %v492_v32 }
 0x138   :  { %v544_v37 = vpop.permute.xlu1 %543  ;;  %v569_v38 = vpop.permute.xlu0 %568 }
 0x139   :  { %v636_v41 = vmax.f32 %v620_v36, 0.0  ;;  %v605_v42 = vmul.f32 %v544_v37, %v246_v12  ;;  %v610_v43 = vmul.f32 %v569_v38, %v265_v9 }
 0x13b   :  { %652 = vst [vmem:[%s1043_s3 + $0x18] sm:$0xff] %v636_v41  ;;  %v621_v44 = vadd.f32 %v605_v42, %v493_v39  ;;  %v626_v45 = vadd.f32 %v610_v43, %v498_v40 }
 0x13c   :  { %v549_v46 = vpop.permute.xlu1 %548  ;;  %v579_v47 = vpop.permute.xlu0 %578 }
 0x13d   :  { %v637_v50 = vmax.f32 %v621_v44, 0.0  ;;  %v606_v51 = vmul.f32 %v549_v46, %v249_v16  ;;  %v612_v52 = vmul.f32 %v728_v7, %v579_v47  ;;  %v642_v53 = vmax.f32 %v626_v45, 0.0 }
 0x13f   :  { %653 = vst [vmem:[%s1043_s3 + $0x20] sm:$0xff] %v637_v50  ;;  %v622_v54 = vadd.f32 %v606_v51, %v494_v48  ;;  %v628_v55 = vadd.f32 %v612_v52, %v500_v49  ;;  %658 = vst [vmem:[%s1043_s3 + $0x48] sm:$0xff] %v642_v53 }
 0x140   :  { %v554_v57 = vpop.permute.xlu1 %553  ;;  %v589_v58 = vpop.permute.xlu0 %588 }
 0x141   :  { %v638_v60 = vmax.f32 %v622_v54, 0.0  ;;  %v644_v61 = vmax.f32 %v628_v55, 0.0  ;;  %v607_v62 = vmul.f32 %v723_v10, %v554_v57  ;;  %v614_v63 = vmul.f32 %v589_v58, %v281_v17 }
 0x143   :  { %654 = vst [vmem:[%s1043_s3 + $0x28] sm:$0xff] %v638_v60  ;;  %660 = vst [vmem:[%s1043_s3 + $0x58] sm:$0xff] %v644_v61  ;;  %v623_v0 = vadd.f32 %v607_v62, %v495_v56  ;;  %v630_v1 = vadd.f32 %v614_v63, %v502_v59 }
 0x144   :  { %v559_v4 = vpop.permute.xlu1 %558  ;;  %v599_v7 = vpop.permute.xlu0 %598 }
 0x145   :  { %v639_v8 = vmax.f32 %v623_v0, 0.0  ;;  %v646_v9 = vmax.f32 %v630_v1, 0.0  ;;  %v608_v10 = vmul.f32 %v934_v14, %v559_v4  ;;  %v616_v12 = vmul.f32 %v936_v15, %v599_v7 }
 0x147   :  { %655 = vst [vmem:[%s1043_s3 + $0x30] sm:$0xff] %v639_v8  ;;  %662 = vst [vmem:[%s1043_s3 + $0x68] sm:$0xff] %v646_v9  ;;  %v624_v16 = vadd.f32 %v608_v10, %v496_v2  ;;  %v632_v17 = vadd.f32 %v616_v12, %v504_v6 }
 0x148   :  { %v564_v19 = vpop.permute.xlu1 %563 }
 0x149   :  { %v640_v20 = vmax.f32 %v624_v16, 0.0  ;;  %v648_v21 = vmax.f32 %v632_v17, 0.0  ;;  %v609_v14 = vmul.f32 %v564_v19, %v928_v5 }
 0x14b   :  { %656 = vst [vmem:[%s1043_s3 + $0x38] sm:$0xff] %v640_v20  ;;  %664 = vst [vmem:[%s1043_s3 + $0x78] sm:$0xff] %v648_v21  ;;  %v625_v15 = vadd.f32 %v609_v14, %v497_v18 }
 0x14c   :  { %v574_v23 = vpop.permute.xlu1 %573 }
 0x14d   :  { %v641_v24 = vmax.f32 %v625_v15, 0.0  ;;  %v611_v25 = vmul.f32 %v926_v3, %v574_v23  ;;  %v503_v3 = vld [vmem:[%s1042_s2 + $0x70] sm:$0xff] }
 0x14f   :  { %657 = vst [vmem:[%s1043_s3 + $0x40] sm:$0xff] %v641_v24  ;;  %v627_v5 = vadd.f32 %v611_v25, %v499_v22 }
 0x150   :  { %v584_v27 = vpop.permute.xlu1 %583 }
 0x151   :  { %v643_v28 = vmax.f32 %v627_v5, 0.0  ;;  %v613_v29 = vmul.f32 %v584_v27, %v932_v13 }
 0x153   :  { %659 = vst [vmem:[%s1043_s3 + $0x50] sm:$0xff] %v643_v28  ;;  %v629_v30 = vadd.f32 %v613_v29, %v501_v26 }
 0x154   :  { %v594_v31 = vpop.permute.xlu1 %593 }
 0x155   :  { %v645_v32 = vmax.f32 %v629_v30, 0.0  ;;  %v615_v33 = vmul.f32 %v930_v11, %v594_v31 }
 0x157   :  { %661 = vst [vmem:[%s1043_s3 + $0x60] sm:$0xff] %v645_v32  ;;  %v631_v34 = vadd.f32 %v615_v33, %v503_v3 }
 0x159   :  { %v647_v35 = vmax.f32 %v631_v34, 0.0 }
 0x15b   :  { %663 = vst [vmem:[%s1043_s3 + $0x70] sm:$0xff] %v647_v35 }

</bundles_post_ra>
